<compile_context>
chip_gen: v5e
topology: v5e:2x2
jax: 0.10.0
libtpu: 0.0.40
codegen_flags: <defaults>
</compile_context>

<pallas_src>
import functools
import math

import jax
import jax.numpy as jnp
from jax.experimental import pallas as pl
from jax.experimental.pallas import tpu as pltpu


def _layernorm(v, g, b, eps=1e-5):
    mu = jnp.mean(v, axis=-1, keepdims=True)
    var = jnp.mean((v - mu) ** 2, axis=-1, keepdims=True)
    return (v - mu) * jax.lax.rsqrt(var + eps) * g + b


def transformer_layer_kernel(
    x_ref,
    ln1_g_ref, ln1_b_ref,
    wq_ref, bq_ref, wkv_ref, bkv_ref, wo_ref, bo_ref,
    ln2_g_ref, ln2_b_ref,
    w1_ref, b1_ref, w2_ref, b2_ref,
    o_ref,
    *, num_heads: int,
):
    f32 = jnp.float32
    bf16 = jnp.bfloat16

    S, D = x_ref.shape            # full sequence of this batch element
    TQ = o_ref.shape[0]           # q-tile rows handled by this grid step
    hd = D // num_heads
    scale = 1.0 / math.sqrt(hd)
    q_start = pl.multiple_of(pl.program_id(1) * TQ, TQ)

    # ---- pre-norm 1 ----
    x_full = x_ref[...].astype(f32)                        # (S, D)  K/V source
    xq = x_ref[pl.ds(q_start, TQ), :].astype(f32)          # (TQ, D) residual / Q rows
    ln1_g = ln1_g_ref[...]
    ln1_b = ln1_b_ref[...]
    xn_full = _layernorm(x_full, ln1_g, ln1_b)
    xn_q = _layernorm(xq, ln1_g, ln1_b)

    # ---- fused full-width projections (bf16 MXU operands, f32 accumulation) ----
    q = jnp.dot(xn_q.astype(bf16), wq_ref[...],
                preferred_element_type=f32) + bq_ref[...]          # (TQ, D)
    q = (q * scale).astype(bf16)            # fold 1/sqrt(hd) into q (TQ*D VPU op)
    kv = jnp.dot(xn_full.astype(bf16), wkv_ref[...],
                 preferred_element_type=f32) + bkv_ref[...]        # (S, 2D)
    k = kv[:, :D].astype(bf16)
    v = kv[:, D:].astype(bf16)

    # ---- attention: heads are static lane views of the fused projections ----
    ctx_heads = []
    for h in range(num_heads):
        sl = slice(h * hd, (h + 1) * hd)
        s = jnp.einsum("qd,kd->qk", q[:, sl], k[:, sl],
                       preferred_element_type=f32)                 # (TQ, S)
        s = s - jnp.max(s, axis=-1, keepdims=True)
        p = jnp.exp(s)                                             # f32 EUP
        l = jnp.sum(p, axis=-1, keepdims=True)                     # (TQ, 1)
        ctx_h = jnp.dot(p.astype(bf16), v[:, sl],
                        preferred_element_type=f32)                # (TQ, hd)
        # normalise after the PV matmul: TQ*hd multiplies instead of TQ*S
        ctx_heads.append(ctx_h * pl.reciprocal(l, approx=True))
    ctx = jnp.concatenate(ctx_heads, axis=-1)                      # (TQ, D)

    # Output projection: head reduction fused into one (TQ,D)@(D,D) MXU matmul.
    attn = jnp.dot(ctx.astype(bf16), wo_ref[...],
                   preferred_element_type=f32) + bo_ref[...]

    # TODO(synk): dropout omitted (eval mode -> identity)
    y = xq + attn

    # ---- pre-norm 2 + feed-forward (on this q tile only) ----
    yn = _layernorm(y, ln2_g_ref[...], ln2_b_ref[...])
    h1 = jnp.dot(yn.astype(bf16), w1_ref[...],
                 preferred_element_type=f32) + b1_ref[...]
    # TODO(synk): reference FeedForward activation unspecified; using tanh-GELU.
    h1 = jax.nn.gelu(h1, approximate=True)
    ffn = jnp.dot(h1.astype(bf16), w2_ref[...],
                  preferred_element_type=f32) + b2_ref[...]

    o_ref[...] = (y + ffn).astype(o_ref.dtype)


def transformer_layer(x, params, *, num_heads):
    B, S, D = x.shape
    F = params["w1"].shape[1]
    assert D % num_heads == 0
    bf16 = jnp.bfloat16

    # q-tile size: second (parallel) grid axis -> bounds the per-step score /
    # FFN-hidden working set and feeds both v7x TensorCores.
    TQ = min(S, 128)
    if S % TQ != 0:
        TQ = S
    nqt = S // TQ

    # Layout plumbing outside the kernel: K/V weights fused into one (D, 2D)
    # operand, MXU weights cast to bf16 (halves weight VMEM); biases / LN
    # params stay f32 (added after f32 accumulation).
    wq = params["wq"].astype(bf16)
    wkv = jnp.concatenate([params["wk"], params["wv"]], axis=1).astype(bf16)
    bkv = jnp.concatenate([params["bk"], params["bv"]], axis=1)
    wo = params["wo"].astype(bf16)
    w1 = params["w1"].astype(bf16)
    w2 = params["w2"].astype(bf16)

    kernel = functools.partial(transformer_layer_kernel, num_heads=num_heads)

    # Advisory cost estimate so XLA schedules surrounding HLO around this op.
    flops = int(B * (2 * S * D * 4 * D + 4 * S * S * D + 4 * S * D * F))
    transcendentals = int(B * (num_heads * S * S + S * F + 2 * S))
    weight_bytes = int((4 * D * D + 2 * D * F) * 2)            # bf16 weights
    bytes_accessed = int(2 * B * S * D * 4 + weight_bytes)
    cost = pl.CostEstimate(flops=flops, transcendentals=transcendentals,
                           bytes_accessed=bytes_accessed)

    # Scoped-VMEM budget: single-buffered weights + per-step activations (+headroom).
    act_bytes = 4 * (3 * S * D + 2 * S * D + 2 * TQ * S + TQ * F + 6 * TQ * D)
    vmem_limit = int(min(128 * 1024 * 1024,
                         max(32 * 1024 * 1024, 4 * (weight_bytes + act_bytes))))

    args = (x,
            params["ln1_g"], params["ln1_b"],
            wq, params["bq"], wkv, bkv, wo, params["bo"],
            params["ln2_g"], params["ln2_b"],
            w1, params["b1"], w2, params["b2"])

    def build(single_buffer_weights):
        # Grid-invariant weights/biases -> single buffer instead of Pallas'
        # default double buffering (saves ~weight_bytes of VMEM).
        wmode = pl.Buffered(1) if single_buffer_weights else None

        def const(shape):
            nd = len(shape)
            idx = lambda b, q, _nd=nd: (0,) * _nd
            if wmode is None:
                return pl.BlockSpec(shape, idx)
            return pl.BlockSpec(shape, idx, pipeline_mode=wmode)

        in_specs = [
            pl.BlockSpec((None, S, D), lambda b, q: (b, 0, 0)),   # x (1 batch elem)
            const((1, D)), const((1, D)),                         # ln1 gamma/beta
            const((D, D)), const((1, D)),                         # wq, bq
            const((D, 2 * D)), const((1, 2 * D)),                 # wkv, bkv
            const((D, D)), const((1, D)),                         # wo, bo
            const((1, D)), const((1, D)),                         # ln2 gamma/beta
            const((D, F)), const((1, F)),                         # w1, b1
            const((F, D)), const((1, D)),                         # w2, b2
        ]
        out_spec = pl.BlockSpec((None, TQ, D), lambda b, q: (b, q, 0))

        return pl.pallas_call(
            kernel,
            out_shape=jax.ShapeDtypeStruct((B, S, D), x.dtype),
            grid=(B, nqt),
            in_specs=in_specs,
            out_specs=out_spec,
            compiler_params=pltpu.CompilerParams(
                dimension_semantics=("parallel", "parallel"),
                vmem_limit_bytes=vmem_limit,
            ),
            cost_estimate=cost,
        )

    try:
        return build(True)(*args)
    except Exception:
        # TODO(synk): pl.Buffered(1) unavailable on this jax version -> fall
        # back to default double-buffered weight blocks (same semantics).
        return build(False)(*args)


def init_params(key, dim, ffn_hidden):
    ks = jax.random.split(key, 8)
    std = 0.02
    return {
        "ln1_g": jnp.ones((1, dim), jnp.float32),
        "ln1_b": jnp.zeros((1, dim), jnp.float32),
        "wq": std * jax.random.normal(ks[0], (dim, dim), jnp.float32),
        "bq": jnp.zeros((1, dim), jnp.float32),
        "wk": std * jax.random.normal(ks[1], (dim, dim), jnp.float32),
        "bk": jnp.zeros((1, dim), jnp.float32),
        "wv": std * jax.random.normal(ks[2], (dim, dim), jnp.float32),
        "bv": jnp.zeros((1, dim), jnp.float32),
        "wo": std * jax.random.normal(ks[3], (dim, dim), jnp.float32),
        "bo": jnp.zeros((1, dim), jnp.float32),
        "ln2_g": jnp.ones((1, dim), jnp.float32),
        "ln2_b": jnp.zeros((1, dim), jnp.float32),
        "w1": std * jax.random.normal(ks[4], (dim, ffn_hidden), jnp.float32),
        "b1": jnp.zeros((1, ffn_hidden), jnp.float32),
        "w2": std * jax.random.normal(ks[5], (ffn_hidden, dim), jnp.float32),
        "b2": jnp.zeros((1, dim), jnp.float32),
    }


def reference(x, params, num_heads):
    # Pure-JAX f32 reference (same math, original weight layout).
    def ln(v, g, b, eps=1e-5):
        mu = v.mean(-1, keepdims=True)
        var = ((v - mu) ** 2).mean(-1, keepdims=True)
        return (v - mu) / jnp.sqrt(var + eps) * g + b

    B, S, D = x.shape
    hd = D // num_heads
    xn = ln(x, params["ln1_g"], params["ln1_b"])
    q = xn @ params["wq"] + params["bq"]
    k = xn @ params["wk"] + params["bk"]
    v = xn @ params["wv"] + params["bv"]
    q = q.reshape(B, S, num_heads, hd).transpose(0, 2, 1, 3)
    k = k.reshape(B, S, num_heads, hd).transpose(0, 2, 1, 3)
    v = v.reshape(B, S, num_heads, hd).transpose(0, 2, 1, 3)
    s = jnp.einsum("bhqd,bhkd->bhqk", q, k) / math.sqrt(hd)
    p = jax.nn.softmax(s, axis=-1)
    ctx = jnp.einsum("bhqk,bhkd->bhqd", p, v).transpose(0, 2, 1, 3).reshape(B, S, D)
    x = x + ctx @ params["wo"] + params["bo"]
    xn2 = ln(x, params["ln2_g"], params["ln2_b"])
    h1 = jax.nn.gelu(xn2 @ params["w1"] + params["b1"], approximate=True)
    return x + h1 @ params["w2"] + params["b2"]


if __name__ == "__main__":
    # NOTE: demo shapes are intentionally tiny; perf should only be judged on
    # (8,128)-aligned shapes (D, hd multiples of 128; S a multiple of 8).
    B, S, D = 2, 8, 32
    num_heads = 4
    ffn_hidden = 4 * D

    key = jax.random.PRNGKey(0)
    kx, kp = jax.random.split(key)
    x = jax.random.normal(kx, (B, S, D), jnp.float32)
    params = init_params(kp, D, ffn_hidden)

    out = transformer_layer(x, params, num_heads=num_heads)
    jax.block_until_ready(out)

    assert out.shape == (B, S, D)
    ref = reference(x, params, num_heads)
    assert bool(jnp.isfinite(out).all())
    assert bool(jnp.allclose(out, ref, atol=5e-2, rtol=5e-2)), "mismatch vs reference"
    print("KERNEL_OK")
</pallas_src>

<mosaic_0001>
module attributes {stable_mosaic.version = 11 : i64} {
  func.func @transformer_layer_kernel(%arg0: i32, %arg1: i32, %arg2: memref<1x8x32xf32, #tpu.memory_space<vmem>>, %arg3: memref<1x32xf32, #tpu.memory_space<vmem>>, %arg4: memref<1x32xf32, #tpu.memory_space<vmem>>, %arg5: memref<32x32xbf16, #tpu.memory_space<vmem>>, %arg6: memref<1x32xf32, #tpu.memory_space<vmem>>, %arg7: memref<32x64xbf16, #tpu.memory_space<vmem>>, %arg8: memref<1x64xf32, #tpu.memory_space<vmem>>, %arg9: memref<32x32xbf16, #tpu.memory_space<vmem>>, %arg10: memref<1x32xf32, #tpu.memory_space<vmem>>, %arg11: memref<1x32xf32, #tpu.memory_space<vmem>>, %arg12: memref<1x32xf32, #tpu.memory_space<vmem>>, %arg13: memref<32x128xbf16, #tpu.memory_space<vmem>>, %arg14: memref<1x128xf32, #tpu.memory_space<vmem>>, %arg15: memref<128x32xbf16, #tpu.memory_space<vmem>>, %arg16: memref<1x32xf32, #tpu.memory_space<vmem>>, %arg17: memref<1x8x32xf32, #tpu.memory_space<vmem>>) attributes {dimension_semantics = [#tpu.dimension_semantics<parallel>, #tpu.dimension_semantics<parallel>], iteration_bounds = array<i64: 2, 1>, scalar_prefetch = 0 : i64, scratch_operands = 0 : i64, tpu.core_type = #tpu.core_type<tc>, window_params = [{transform_indices = @transform_0, window_bounds = array<i64: 1, 8, 32>}, {pipeline_mode = #tpu.pipeline_mode<synchronous>, transform_indices = @transform_1, window_bounds = array<i64: 1, 32>}, {pipeline_mode = #tpu.pipeline_mode<synchronous>, transform_indices = @transform_2, window_bounds = array<i64: 1, 32>}, {pipeline_mode = #tpu.pipeline_mode<synchronous>, transform_indices = @transform_3, window_bounds = array<i64: 32, 32>}, {pipeline_mode = #tpu.pipeline_mode<synchronous>, transform_indices = @transform_4, window_bounds = array<i64: 1, 32>}, {pipeline_mode = #tpu.pipeline_mode<synchronous>, transform_indices = @transform_5, window_bounds = array<i64: 32, 64>}, {pipeline_mode = #tpu.pipeline_mode<synchronous>, transform_indices = @transform_6, window_bounds = array<i64: 1, 64>}, {pipeline_mode = #tpu.pipeline_mode<synchronous>, transform_indices = @transform_7, window_bounds = array<i64: 32, 32>}, {pipeline_mode = #tpu.pipeline_mode<synchronous>, transform_indices = @transform_8, window_bounds = array<i64: 1, 32>}, {pipeline_mode = #tpu.pipeline_mode<synchronous>, transform_indices = @transform_9, window_bounds = array<i64: 1, 32>}, {pipeline_mode = #tpu.pipeline_mode<synchronous>, transform_indices = @transform_10, window_bounds = array<i64: 1, 32>}, {pipeline_mode = #tpu.pipeline_mode<synchronous>, transform_indices = @transform_11, window_bounds = array<i64: 32, 128>}, {pipeline_mode = #tpu.pipeline_mode<synchronous>, transform_indices = @transform_12, window_bounds = array<i64: 1, 128>}, {pipeline_mode = #tpu.pipeline_mode<synchronous>, transform_indices = @transform_13, window_bounds = array<i64: 128, 32>}, {pipeline_mode = #tpu.pipeline_mode<synchronous>, transform_indices = @transform_14, window_bounds = array<i64: 1, 32>}, {transform_indices = @transform_15, window_bounds = array<i64: 1, 8, 32>}]} {
    %c8_i32 = arith.constant 8 : i32
    %0 = arith.muli %arg1, %c8_i32 : i32
    %1 = tpu.assume_multiple %0, 8 : i32
    %c0 = arith.constant 0 : index
    %c0_0 = arith.constant 0 : index
    %c0_1 = arith.constant 0 : index
    %2 = vector.load %arg2[%c0, %c0_0, %c0_1] : memref<1x8x32xf32, #tpu.memory_space<vmem>>, vector<1x8x32xf32>
    %3 = vector.shape_cast %2 : vector<1x8x32xf32> to vector<8x32xf32>
    %c0_2 = arith.constant 0 : index
    %4 = arith.index_cast %1 : i32 to index
    %c0_3 = arith.constant 0 : index
    %5 = vector.load %arg2[%c0_2, %4, %c0_3] : memref<1x8x32xf32, #tpu.memory_space<vmem>>, vector<1x8x32xf32>
    %6 = vector.shape_cast %5 : vector<1x8x32xf32> to vector<8x32xf32>
    %c0_4 = arith.constant 0 : index
    %c0_5 = arith.constant 0 : index
    %7 = vector.load %arg3[%c0_4, %c0_5] : memref<1x32xf32, #tpu.memory_space<vmem>>, vector<1x32xf32>
    %c0_6 = arith.constant 0 : index
    %c0_7 = arith.constant 0 : index
    %8 = vector.load %arg4[%c0_6, %c0_7] : memref<1x32xf32, #tpu.memory_space<vmem>>, vector<1x32xf32>
    %cst = arith.constant dense<0.000000e+00> : vector<8xf32>
    %9 = vector.multi_reduction <add>, %3, %cst [1] : vector<8x32xf32> to vector<8xf32>
    %10 = vector.shape_cast %9 : vector<8xf32> to vector<8x1xf32>
    %cst_8 = arith.constant 3.200000e+01 : f32
    %11 = vector.broadcast %cst_8 : f32 to vector<8x1xf32>
    %12 = arith.divf %10, %11 : vector<8x1xf32>
    %13 = vector.broadcast %12 : vector<8x1xf32> to vector<8x32xf32>
    %14 = arith.subf %3, %13 : vector<8x32xf32>
    %15 = arith.mulf %14, %14 : vector<8x32xf32>
    %cst_9 = arith.constant dense<0.000000e+00> : vector<8xf32>
    %16 = vector.multi_reduction <add>, %15, %cst_9 [1] : vector<8x32xf32> to vector<8xf32>
    %17 = vector.shape_cast %16 : vector<8xf32> to vector<8x1xf32>
    %cst_10 = arith.constant 3.200000e+01 : f32
    %18 = vector.broadcast %cst_10 : f32 to vector<8x1xf32>
    %19 = arith.divf %17, %18 : vector<8x1xf32>
    %20 = vector.broadcast %12 : vector<8x1xf32> to vector<8x32xf32>
    %21 = arith.subf %3, %20 : vector<8x32xf32>
    %cst_11 = arith.constant 9.99999974E-6 : f32
    %22 = vector.broadcast %cst_11 : f32 to vector<8x1xf32>
    %23 = arith.addf %19, %22 : vector<8x1xf32>
    %24 = math.rsqrt %23 : vector<8x1xf32>
    %25 = vector.broadcast %24 : vector<8x1xf32> to vector<8x32xf32>
    %26 = arith.mulf %21, %25 : vector<8x32xf32>
    %27 = vector.broadcast %7 : vector<1x32xf32> to vector<8x32xf32>
    %28 = arith.mulf %26, %27 : vector<8x32xf32>
    %29 = vector.broadcast %8 : vector<1x32xf32> to vector<8x32xf32>
    %30 = arith.addf %28, %29 : vector<8x32xf32>
    %cst_12 = arith.constant dense<0.000000e+00> : vector<8xf32>
    %31 = vector.multi_reduction <add>, %6, %cst_12 [1] : vector<8x32xf32> to vector<8xf32>
    %32 = vector.shape_cast %31 : vector<8xf32> to vector<8x1xf32>
    %cst_13 = arith.constant 3.200000e+01 : f32
    %33 = vector.broadcast %cst_13 : f32 to vector<8x1xf32>
    %34 = arith.divf %32, %33 : vector<8x1xf32>
    %35 = vector.broadcast %34 : vector<8x1xf32> to vector<8x32xf32>
    %36 = arith.subf %6, %35 : vector<8x32xf32>
    %37 = arith.mulf %36, %36 : vector<8x32xf32>
    %cst_14 = arith.constant dense<0.000000e+00> : vector<8xf32>
    %38 = vector.multi_reduction <add>, %37, %cst_14 [1] : vector<8x32xf32> to vector<8xf32>
    %39 = vector.shape_cast %38 : vector<8xf32> to vector<8x1xf32>
    %cst_15 = arith.constant 3.200000e+01 : f32
    %40 = vector.broadcast %cst_15 : f32 to vector<8x1xf32>
    %41 = arith.divf %39, %40 : vector<8x1xf32>
    %42 = vector.broadcast %34 : vector<8x1xf32> to vector<8x32xf32>
    %43 = arith.subf %6, %42 : vector<8x32xf32>
    %cst_16 = arith.constant 9.99999974E-6 : f32
    %44 = vector.broadcast %cst_16 : f32 to vector<8x1xf32>
    %45 = arith.addf %41, %44 : vector<8x1xf32>
    %46 = math.rsqrt %45 : vector<8x1xf32>
    %47 = vector.broadcast %46 : vector<8x1xf32> to vector<8x32xf32>
    %48 = arith.mulf %43, %47 : vector<8x32xf32>
    %49 = vector.broadcast %7 : vector<1x32xf32> to vector<8x32xf32>
    %50 = arith.mulf %48, %49 : vector<8x32xf32>
    %51 = vector.broadcast %8 : vector<1x32xf32> to vector<8x32xf32>
    %52 = arith.addf %50, %51 : vector<8x32xf32>
    %53 = arith.truncf %52 : vector<8x32xf32> to vector<8x32xbf16>
    %c0_17 = arith.constant 0 : index
    %c0_18 = arith.constant 0 : index
    %54 = vector.load %arg5[%c0_17, %c0_18] : memref<32x32xbf16, #tpu.memory_space<vmem>>, vector<32x32xbf16>
    %cst_19 = arith.constant dense<0.000000e+00> : vector<8x32xf32>
    %55 = tpu.matmul %53, %54, %cst_19 {dimension_numbers = #tpu.dot_dimension_numbers<[1], [0], [0], [1], [0, 0, 1, 1], [], []>} : vector<8x32xbf16>, vector<32x32xbf16>, vector<8x32xf32> -> vector<8x32xf32>
    %c0_20 = arith.constant 0 : index
    %c0_21 = arith.constant 0 : index
    %56 = vector.load %arg6[%c0_20, %c0_21] : memref<1x32xf32, #tpu.memory_space<vmem>>, vector<1x32xf32>
    %57 = vector.broadcast %56 : vector<1x32xf32> to vector<8x32xf32>
    %58 = arith.addf %55, %57 : vector<8x32xf32>
    %cst_22 = arith.constant 0.353553385 : f32
    %59 = vector.broadcast %cst_22 : f32 to vector<8x32xf32>
    %60 = arith.mulf %58, %59 : vector<8x32xf32>
    %61 = arith.truncf %60 : vector<8x32xf32> to vector<8x32xbf16>
    %62 = arith.truncf %30 : vector<8x32xf32> to vector<8x32xbf16>
    %c0_23 = arith.constant 0 : index
    %c0_24 = arith.constant 0 : index
    %63 = vector.load %arg7[%c0_23, %c0_24] : memref<32x64xbf16, #tpu.memory_space<vmem>>, vector<32x64xbf16>
    %cst_25 = arith.constant dense<0.000000e+00> : vector<8x64xf32>
    %64 = tpu.matmul %62, %63, %cst_25 {dimension_numbers = #tpu.dot_dimension_numbers<[1], [0], [0], [1], [0, 0, 1, 1], [], []>} : vector<8x32xbf16>, vector<32x64xbf16>, vector<8x64xf32> -> vector<8x64xf32>
    %c0_26 = arith.constant 0 : index
    %c0_27 = arith.constant 0 : index
    %65 = vector.load %arg8[%c0_26, %c0_27] : memref<1x64xf32, #tpu.memory_space<vmem>>, vector<1x64xf32>
    %66 = vector.broadcast %65 : vector<1x64xf32> to vector<8x64xf32>
    %67 = arith.addf %64, %66 : vector<8x64xf32>
    %68 = vector.extract_strided_slice %67 {offsets = [0, 0], sizes = [8, 32], strides = [1, 1]} : vector<8x64xf32> to vector<8x32xf32>
    %69 = arith.truncf %68 : vector<8x32xf32> to vector<8x32xbf16>
    %70 = vector.extract_strided_slice %67 {offsets = [0, 32], sizes = [8, 32], strides = [1, 1]} : vector<8x64xf32> to vector<8x32xf32>
    %71 = arith.truncf %70 : vector<8x32xf32> to vector<8x32xbf16>
    %72 = vector.extract_strided_slice %61 {offsets = [0, 0], sizes = [8, 8], strides = [1, 1]} : vector<8x32xbf16> to vector<8x8xbf16>
    %73 = vector.extract_strided_slice %69 {offsets = [0, 0], sizes = [8, 8], strides = [1, 1]} : vector<8x32xbf16> to vector<8x8xbf16>
    "tpu.trace_start"() <{level = 10 : i32, message = "qd,kd->qk"}> : () -> ()
    %cst_28 = arith.constant dense<0.000000e+00> : vector<8x8xf32>
    %74 = tpu.matmul %72, %73, %cst_28 {dimension_numbers = #tpu.dot_dimension_numbers<[1], [1], [0], [0], [0, 0, 1, 0], [], []>} : vector<8x8xbf16>, vector<8x8xbf16>, vector<8x8xf32> -> vector<8x8xf32>
    "tpu.trace_stop"() : () -> ()
    %cst_29 = arith.constant dense<0xFF800000> : vector<8xf32>
    %75 = vector.multi_reduction <maximumf>, %74, %cst_29 [1] : vector<8x8xf32> to vector<8xf32>
    %76 = vector.shape_cast %75 : vector<8xf32> to vector<8x1xf32>
    %77 = vector.broadcast %76 : vector<8x1xf32> to vector<8x8xf32>
    %78 = arith.subf %74, %77 : vector<8x8xf32>
    %79 = math.exp %78 : vector<8x8xf32>
    %cst_30 = arith.constant dense<0.000000e+00> : vector<8xf32>
    %80 = vector.multi_reduction <add>, %79, %cst_30 [1] : vector<8x8xf32> to vector<8xf32>
    %81 = vector.shape_cast %80 : vector<8xf32> to vector<8x1xf32>
    %82 = arith.truncf %79 : vector<8x8xf32> to vector<8x8xbf16>
    %83 = vector.extract_strided_slice %71 {offsets = [0, 0], sizes = [8, 8], strides = [1, 1]} : vector<8x32xbf16> to vector<8x8xbf16>
    %cst_31 = arith.constant dense<0.000000e+00> : vector<8x8xf32>
    %84 = tpu.matmul %82, %83, %cst_31 {dimension_numbers = #tpu.dot_dimension_numbers<[1], [0], [0], [1], [0, 0, 1, 1], [], []>} : vector<8x8xbf16>, vector<8x8xbf16>, vector<8x8xf32> -> vector<8x8xf32>
    %85 = tpu.reciprocal %81 {approx = true} : vector<8x1xf32> -> vector<8x1xf32>
    %86 = vector.broadcast %85 : vector<8x1xf32> to vector<8x8xf32>
    %87 = arith.mulf %84, %86 : vector<8x8xf32>
    %88 = vector.extract_strided_slice %61 {offsets = [0, 8], sizes = [8, 8], strides = [1, 1]} : vector<8x32xbf16> to vector<8x8xbf16>
    %89 = vector.extract_strided_slice %69 {offsets = [0, 8], sizes = [8, 8], strides = [1, 1]} : vector<8x32xbf16> to vector<8x8xbf16>
    "tpu.trace_start"() <{level = 10 : i32, message = "qd,kd->qk"}> : () -> ()
    %cst_32 = arith.constant dense<0.000000e+00> : vector<8x8xf32>
    %90 = tpu.matmul %88, %89, %cst_32 {dimension_numbers = #tpu.dot_dimension_numbers<[1], [1], [0], [0], [0, 0, 1, 0], [], []>} : vector<8x8xbf16>, vector<8x8xbf16>, vector<8x8xf32> -> vector<8x8xf32>
    "tpu.trace_stop"() : () -> ()
    %cst_33 = arith.constant dense<0xFF800000> : vector<8xf32>
    %91 = vector.multi_reduction <maximumf>, %90, %cst_33 [1] : vector<8x8xf32> to vector<8xf32>
    %92 = vector.shape_cast %91 : vector<8xf32> to vector<8x1xf32>
    %93 = vector.broadcast %92 : vector<8x1xf32> to vector<8x8xf32>
    %94 = arith.subf %90, %93 : vector<8x8xf32>
    %95 = math.exp %94 : vector<8x8xf32>
    %cst_34 = arith.constant dense<0.000000e+00> : vector<8xf32>
    %96 = vector.multi_reduction <add>, %95, %cst_34 [1] : vector<8x8xf32> to vector<8xf32>
    %97 = vector.shape_cast %96 : vector<8xf32> to vector<8x1xf32>
    %98 = arith.truncf %95 : vector<8x8xf32> to vector<8x8xbf16>
    %99 = vector.extract_strided_slice %71 {offsets = [0, 8], sizes = [8, 8], strides = [1, 1]} : vector<8x32xbf16> to vector<8x8xbf16>
    %cst_35 = arith.constant dense<0.000000e+00> : vector<8x8xf32>
    %100 = tpu.matmul %98, %99, %cst_35 {dimension_numbers = #tpu.dot_dimension_numbers<[1], [0], [0], [1], [0, 0, 1, 1], [], []>} : vector<8x8xbf16>, vector<8x8xbf16>, vector<8x8xf32> -> vector<8x8xf32>
    %101 = tpu.reciprocal %97 {approx = true} : vector<8x1xf32> -> vector<8x1xf32>
    %102 = vector.broadcast %101 : vector<8x1xf32> to vector<8x8xf32>
    %103 = arith.mulf %100, %102 : vector<8x8xf32>
    %104 = vector.extract_strided_slice %61 {offsets = [0, 16], sizes = [8, 8], strides = [1, 1]} : vector<8x32xbf16> to vector<8x8xbf16>
    %105 = vector.extract_strided_slice %69 {offsets = [0, 16], sizes = [8, 8], strides = [1, 1]} : vector<8x32xbf16> to vector<8x8xbf16>
    "tpu.trace_start"() <{level = 10 : i32, message = "qd,kd->qk"}> : () -> ()
    %cst_36 = arith.constant dense<0.000000e+00> : vector<8x8xf32>
    %106 = tpu.matmul %104, %105, %cst_36 {dimension_numbers = #tpu.dot_dimension_numbers<[1], [1], [0], [0], [0, 0, 1, 0], [], []>} : vector<8x8xbf16>, vector<8x8xbf16>, vector<8x8xf32> -> vector<8x8xf32>
    "tpu.trace_stop"() : () -> ()
    %cst_37 = arith.constant dense<0xFF800000> : vector<8xf32>
    %107 = vector.multi_reduction <maximumf>, %106, %cst_37 [1] : vector<8x8xf32> to vector<8xf32>
    %108 = vector.shape_cast %107 : vector<8xf32> to vector<8x1xf32>
    %109 = vector.broadcast %108 : vector<8x1xf32> to vector<8x8xf32>
    %110 = arith.subf %106, %109 : vector<8x8xf32>
    %111 = math.exp %110 : vector<8x8xf32>
    %cst_38 = arith.constant dense<0.000000e+00> : vector<8xf32>
    %112 = vector.multi_reduction <add>, %111, %cst_38 [1] : vector<8x8xf32> to vector<8xf32>
    %113 = vector.shape_cast %112 : vector<8xf32> to vector<8x1xf32>
    %114 = arith.truncf %111 : vector<8x8xf32> to vector<8x8xbf16>
    %115 = vector.extract_strided_slice %71 {offsets = [0, 16], sizes = [8, 8], strides = [1, 1]} : vector<8x32xbf16> to vector<8x8xbf16>
    %cst_39 = arith.constant dense<0.000000e+00> : vector<8x8xf32>
    %116 = tpu.matmul %114, %115, %cst_39 {dimension_numbers = #tpu.dot_dimension_numbers<[1], [0], [0], [1], [0, 0, 1, 1], [], []>} : vector<8x8xbf16>, vector<8x8xbf16>, vector<8x8xf32> -> vector<8x8xf32>
    %117 = tpu.reciprocal %113 {approx = true} : vector<8x1xf32> -> vector<8x1xf32>
    %118 = vector.broadcast %117 : vector<8x1xf32> to vector<8x8xf32>
    %119 = arith.mulf %116, %118 : vector<8x8xf32>
    %120 = vector.extract_strided_slice %61 {offsets = [0, 24], sizes = [8, 8], strides = [1, 1]} : vector<8x32xbf16> to vector<8x8xbf16>
    %121 = vector.extract_strided_slice %69 {offsets = [0, 24], sizes = [8, 8], strides = [1, 1]} : vector<8x32xbf16> to vector<8x8xbf16>
    "tpu.trace_start"() <{level = 10 : i32, message = "qd,kd->qk"}> : () -> ()
    %cst_40 = arith.constant dense<0.000000e+00> : vector<8x8xf32>
    %122 = tpu.matmul %120, %121, %cst_40 {dimension_numbers = #tpu.dot_dimension_numbers<[1], [1], [0], [0], [0, 0, 1, 0], [], []>} : vector<8x8xbf16>, vector<8x8xbf16>, vector<8x8xf32> -> vector<8x8xf32>
    "tpu.trace_stop"() : () -> ()
    %cst_41 = arith.constant dense<0xFF800000> : vector<8xf32>
    %123 = vector.multi_reduction <maximumf>, %122, %cst_41 [1] : vector<8x8xf32> to vector<8xf32>
    %124 = vector.shape_cast %123 : vector<8xf32> to vector<8x1xf32>
    %125 = vector.broadcast %124 : vector<8x1xf32> to vector<8x8xf32>
    %126 = arith.subf %122, %125 : vector<8x8xf32>
    %127 = math.exp %126 : vector<8x8xf32>
    %cst_42 = arith.constant dense<0.000000e+00> : vector<8xf32>
    %128 = vector.multi_reduction <add>, %127, %cst_42 [1] : vector<8x8xf32> to vector<8xf32>
    %129 = vector.shape_cast %128 : vector<8xf32> to vector<8x1xf32>
    %130 = arith.truncf %127 : vector<8x8xf32> to vector<8x8xbf16>
    %131 = vector.extract_strided_slice %71 {offsets = [0, 24], sizes = [8, 8], strides = [1, 1]} : vector<8x32xbf16> to vector<8x8xbf16>
    %cst_43 = arith.constant dense<0.000000e+00> : vector<8x8xf32>
    %132 = tpu.matmul %130, %131, %cst_43 {dimension_numbers = #tpu.dot_dimension_numbers<[1], [0], [0], [1], [0, 0, 1, 1], [], []>} : vector<8x8xbf16>, vector<8x8xbf16>, vector<8x8xf32> -> vector<8x8xf32>
    %133 = tpu.reciprocal %129 {approx = true} : vector<8x1xf32> -> vector<8x1xf32>
    %134 = vector.broadcast %133 : vector<8x1xf32> to vector<8x8xf32>
    %135 = arith.mulf %132, %134 : vector<8x8xf32>
    %136 = tpu.concatenate %87, %103, %119, %135 in 1 : vector<8x8xf32>, vector<8x8xf32>, vector<8x8xf32>, vector<8x8xf32> -> vector<8x32xf32>
    %137 = arith.truncf %136 : vector<8x32xf32> to vector<8x32xbf16>
    %c0_44 = arith.constant 0 : index
    %c0_45 = arith.constant 0 : index
    %138 = vector.load %arg9[%c0_44, %c0_45] : memref<32x32xbf16, #tpu.memory_space<vmem>>, vector<32x32xbf16>
    %cst_46 = arith.constant dense<0.000000e+00> : vector<8x32xf32>
    %139 = tpu.matmul %137, %138, %cst_46 {dimension_numbers = #tpu.dot_dimension_numbers<[1], [0], [0], [1], [0, 0, 1, 1], [], []>} : vector<8x32xbf16>, vector<32x32xbf16>, vector<8x32xf32> -> vector<8x32xf32>
    %c0_47 = arith.constant 0 : index
    %c0_48 = arith.constant 0 : index
    %140 = vector.load %arg10[%c0_47, %c0_48] : memref<1x32xf32, #tpu.memory_space<vmem>>, vector<1x32xf32>
    %141 = vector.broadcast %140 : vector<1x32xf32> to vector<8x32xf32>
    %142 = arith.addf %139, %141 : vector<8x32xf32>
    %143 = arith.addf %6, %142 : vector<8x32xf32>
    %c0_49 = arith.constant 0 : index
    %c0_50 = arith.constant 0 : index
    %144 = vector.load %arg11[%c0_49, %c0_50] : memref<1x32xf32, #tpu.memory_space<vmem>>, vector<1x32xf32>
    %c0_51 = arith.constant 0 : index
    %c0_52 = arith.constant 0 : index
    %145 = vector.load %arg12[%c0_51, %c0_52] : memref<1x32xf32, #tpu.memory_space<vmem>>, vector<1x32xf32>
    %cst_53 = arith.constant dense<0.000000e+00> : vector<8xf32>
    %146 = vector.multi_reduction <add>, %143, %cst_53 [1] : vector<8x32xf32> to vector<8xf32>
    %147 = vector.shape_cast %146 : vector<8xf32> to vector<8x1xf32>
    %cst_54 = arith.constant 3.200000e+01 : f32
    %148 = vector.broadcast %cst_54 : f32 to vector<8x1xf32>
    %149 = arith.divf %147, %148 : vector<8x1xf32>
    %150 = vector.broadcast %149 : vector<8x1xf32> to vector<8x32xf32>
    %151 = arith.subf %143, %150 : vector<8x32xf32>
    %152 = arith.mulf %151, %151 : vector<8x32xf32>
    %cst_55 = arith.constant dense<0.000000e+00> : vector<8xf32>
    %153 = vector.multi_reduction <add>, %152, %cst_55 [1] : vector<8x32xf32> to vector<8xf32>
    %154 = vector.shape_cast %153 : vector<8xf32> to vector<8x1xf32>
    %cst_56 = arith.constant 3.200000e+01 : f32
    %155 = vector.broadcast %cst_56 : f32 to vector<8x1xf32>
    %156 = arith.divf %154, %155 : vector<8x1xf32>
    %157 = vector.broadcast %149 : vector<8x1xf32> to vector<8x32xf32>
    %158 = arith.subf %143, %157 : vector<8x32xf32>
    %cst_57 = arith.constant 9.99999974E-6 : f32
    %159 = vector.broadcast %cst_57 : f32 to vector<8x1xf32>
    %160 = arith.addf %156, %159 : vector<8x1xf32>
    %161 = math.rsqrt %160 : vector<8x1xf32>
    %162 = vector.broadcast %161 : vector<8x1xf32> to vector<8x32xf32>
    %163 = arith.mulf %158, %162 : vector<8x32xf32>
    %164 = vector.broadcast %144 : vector<1x32xf32> to vector<8x32xf32>
    %165 = arith.mulf %163, %164 : vector<8x32xf32>
    %166 = vector.broadcast %145 : vector<1x32xf32> to vector<8x32xf32>
    %167 = arith.addf %165, %166 : vector<8x32xf32>
    %168 = arith.truncf %167 : vector<8x32xf32> to vector<8x32xbf16>
    %c0_58 = arith.constant 0 : index
    %c0_59 = arith.constant 0 : index
    %169 = vector.load %arg13[%c0_58, %c0_59] : memref<32x128xbf16, #tpu.memory_space<vmem>>, vector<32x128xbf16>
    %cst_60 = arith.constant dense<0.000000e+00> : vector<8x128xf32>
    %170 = tpu.matmul %168, %169, %cst_60 {dimension_numbers = #tpu.dot_dimension_numbers<[1], [0], [0], [1], [0, 0, 1, 1], [], []>} : vector<8x32xbf16>, vector<32x128xbf16>, vector<8x128xf32> -> vector<8x128xf32>
    %c0_61 = arith.constant 0 : index
    %c0_62 = arith.constant 0 : index
    %171 = vector.load %arg14[%c0_61, %c0_62] : memref<1x128xf32, #tpu.memory_space<vmem>>, vector<1x128xf32>
    %172 = vector.broadcast %171 : vector<1x128xf32> to vector<8x128xf32>
    %173 = arith.addf %170, %172 : vector<8x128xf32>
    %174 = arith.mulf %173, %173 : vector<8x128xf32>
    %175 = arith.mulf %173, %174 : vector<8x128xf32>
    %cst_63 = arith.constant 4.471500e-02 : f32
    %176 = vector.broadcast %cst_63 : f32 to vector<8x128xf32>
    %177 = arith.mulf %176, %175 : vector<8x128xf32>
    %178 = arith.addf %173, %177 : vector<8x128xf32>
    %cst_64 = arith.constant 0.797884583 : f32
    %179 = vector.broadcast %cst_64 : f32 to vector<8x128xf32>
    %180 = arith.mulf %179, %178 : vector<8x128xf32>
    %181 = math.tanh %180 : vector<8x128xf32>
    %cst_65 = arith.constant 1.000000e+00 : f32
    %182 = vector.broadcast %cst_65 : f32 to vector<8x128xf32>
    %183 = arith.addf %182, %181 : vector<8x128xf32>
    %cst_66 = arith.constant 5.000000e-01 : f32
    %184 = vector.broadcast %cst_66 : f32 to vector<8x128xf32>
    %185 = arith.mulf %184, %183 : vector<8x128xf32>
    %186 = arith.mulf %173, %185 : vector<8x128xf32>
    %187 = arith.truncf %186 : vector<8x128xf32> to vector<8x128xbf16>
    %c0_67 = arith.constant 0 : index
    %c0_68 = arith.constant 0 : index
    %188 = vector.load %arg15[%c0_67, %c0_68] : memref<128x32xbf16, #tpu.memory_space<vmem>>, vector<128x32xbf16>
    %cst_69 = arith.constant dense<0.000000e+00> : vector<8x32xf32>
    %189 = tpu.matmul %187, %188, %cst_69 {dimension_numbers = #tpu.dot_dimension_numbers<[1], [0], [0], [1], [0, 0, 1, 1], [], []>} : vector<8x128xbf16>, vector<128x32xbf16>, vector<8x32xf32> -> vector<8x32xf32>
    %c0_70 = arith.constant 0 : index
    %c0_71 = arith.constant 0 : index
    %190 = vector.load %arg16[%c0_70, %c0_71] : memref<1x32xf32, #tpu.memory_space<vmem>>, vector<1x32xf32>
    %191 = vector.broadcast %190 : vector<1x32xf32> to vector<8x32xf32>
    %192 = arith.addf %189, %191 : vector<8x32xf32>
    %193 = arith.addf %143, %192 : vector<8x32xf32>
    %c0_72 = arith.constant 0 : index
    %c0_73 = arith.constant 0 : index
    %c0_74 = arith.constant 0 : index
    %194 = vector.load %arg17[%c0_72, %c0_73, %c0_74] : memref<1x8x32xf32, #tpu.memory_space<vmem>>, vector<1x8x32xf32>
    %195 = vector.shape_cast %194 : vector<1x8x32xf32> to vector<8x32xf32>
    %196 = vector.shape_cast %193 : vector<8x32xf32> to vector<1x8x32xf32>
    tpu.vector_store %arg17[%c0_72, %c0_73, %c0_74], %196 {strides = array<i32>} : memref<1x8x32xf32, #tpu.memory_space<vmem>>, vector<1x8x32xf32>,
    return
  }
  func.func @transform_0(%arg0: i32, %arg1: i32) -> (i32, i32, i32) {
    %c0_i32 = arith.constant 0 : i32
    %c0_i32_0 = arith.constant 0 : i32
    %c0_i32_1 = arith.constant 0 : i32
    return %arg0, %c0_i32, %c0_i32_0 : i32, i32, i32
  }
  func.func @transform_1(%arg0: i32, %arg1: i32) -> (i32, i32) {
    %c0_i32 = arith.constant 0 : i32
    %c0_i32_0 = arith.constant 0 : i32
    %c0_i32_1 = arith.constant 0 : i32
    return %c0_i32, %c0_i32_0 : i32, i32
  }
  func.func @transform_2(%arg0: i32, %arg1: i32) -> (i32, i32) {
    %c0_i32 = arith.constant 0 : i32
    %c0_i32_0 = arith.constant 0 : i32
    %c0_i32_1 = arith.constant 0 : i32
    return %c0_i32, %c0_i32_0 : i32, i32
  }
  func.func @transform_3(%arg0: i32, %arg1: i32) -> (i32, i32) {
    %c0_i32 = arith.constant 0 : i32
    %c0_i32_0 = arith.constant 0 : i32
    %c0_i32_1 = arith.constant 0 : i32
    return %c0_i32, %c0_i32_0 : i32, i32
  }
  func.func @transform_4(%arg0: i32, %arg1: i32) -> (i32, i32) {
    %c0_i32 = arith.constant 0 : i32
    %c0_i32_0 = arith.constant 0 : i32
    %c0_i32_1 = arith.constant 0 : i32
    return %c0_i32, %c0_i32_0 : i32, i32
  }
  func.func @transform_5(%arg0: i32, %arg1: i32) -> (i32, i32) {
    %c0_i32 = arith.constant 0 : i32
    %c0_i32_0 = arith.constant 0 : i32
    %c0_i32_1 = arith.constant 0 : i32
    return %c0_i32, %c0_i32_0 : i32, i32
  }
  func.func @transform_6(%arg0: i32, %arg1: i32) -> (i32, i32) {
    %c0_i32 = arith.constant 0 : i32
    %c0_i32_0 = arith.constant 0 : i32
    %c0_i32_1 = arith.constant 0 : i32
    return %c0_i32, %c0_i32_0 : i32, i32
  }
  func.func @transform_7(%arg0: i32, %arg1: i32) -> (i32, i32) {
    %c0_i32 = arith.constant 0 : i32
    %c0_i32_0 = arith.constant 0 : i32
    %c0_i32_1 = arith.constant 0 : i32
    return %c0_i32, %c0_i32_0 : i32, i32
  }
  func.func @transform_8(%arg0: i32, %arg1: i32) -> (i32, i32) {
    %c0_i32 = arith.constant 0 : i32
    %c0_i32_0 = arith.constant 0 : i32
    %c0_i32_1 = arith.constant 0 : i32
    return %c0_i32, %c0_i32_0 : i32, i32
  }
  func.func @transform_9(%arg0: i32, %arg1: i32) -> (i32, i32) {
    %c0_i32 = arith.constant 0 : i32
    %c0_i32_0 = arith.constant 0 : i32
    %c0_i32_1 = arith.constant 0 : i32
    return %c0_i32, %c0_i32_0 : i32, i32
  }
  func.func @transform_10(%arg0: i32, %arg1: i32) -> (i32, i32) {
    %c0_i32 = arith.constant 0 : i32
    %c0_i32_0 = arith.constant 0 : i32
    %c0_i32_1 = arith.constant 0 : i32
    return %c0_i32, %c0_i32_0 : i32, i32
  }
  func.func @transform_11(%arg0: i32, %arg1: i32) -> (i32, i32) {
    %c0_i32 = arith.constant 0 : i32
    %c0_i32_0 = arith.constant 0 : i32
    %c0_i32_1 = arith.constant 0 : i32
    return %c0_i32, %c0_i32_0 : i32, i32
  }
  func.func @transform_12(%arg0: i32, %arg1: i32) -> (i32, i32) {
    %c0_i32 = arith.constant 0 : i32
    %c0_i32_0 = arith.constant 0 : i32
    %c0_i32_1 = arith.constant 0 : i32
    return %c0_i32, %c0_i32_0 : i32, i32
  }
  func.func @transform_13(%arg0: i32, %arg1: i32) -> (i32, i32) {
    %c0_i32 = arith.constant 0 : i32
    %c0_i32_0 = arith.constant 0 : i32
    %c0_i32_1 = arith.constant 0 : i32
    return %c0_i32, %c0_i32_0 : i32, i32
  }
  func.func @transform_14(%arg0: i32, %arg1: i32) -> (i32, i32) {
    %c0_i32 = arith.constant 0 : i32
    %c0_i32_0 = arith.constant 0 : i32
    %c0_i32_1 = arith.constant 0 : i32
    return %c0_i32, %c0_i32_0 : i32, i32
  }
  func.func @transform_15(%arg0: i32, %arg1: i32) -> (i32, i32, i32) {
    %c0_i32 = arith.constant 0 : i32
    %c0_i32_0 = arith.constant 0 : i32
    return %arg0, %arg1, %c0_i32 : i32, i32, i32
  }
}

module attributes {stable_mosaic.version = 11 : i64} {
  func.func @transformer_layer_kernel(%arg0: i32, %arg1: i32, %arg2: memref<1x8x32xf32, #tpu.memory_space<vmem>>, %arg3: memref<1x32xf32, #tpu.memory_space<vmem>>, %arg4: memref<1x32xf32, #tpu.memory_space<vmem>>, %arg5: memref<32x32xbf16, #tpu.memory_space<vmem>>, %arg6: memref<1x32xf32, #tpu.memory_space<vmem>>, %arg7: memref<32x64xbf16, #tpu.memory_space<vmem>>, %arg8: memref<1x64xf32, #tpu.memory_space<vmem>>, %arg9: memref<32x32xbf16, #tpu.memory_space<vmem>>, %arg10: memref<1x32xf32, #tpu.memory_space<vmem>>, %arg11: memref<1x32xf32, #tpu.memory_space<vmem>>, %arg12: memref<1x32xf32, #tpu.memory_space<vmem>>, %arg13: memref<32x128xbf16, #tpu.memory_space<vmem>>, %arg14: memref<1x128xf32, #tpu.memory_space<vmem>>, %arg15: memref<128x32xbf16, #tpu.memory_space<vmem>>, %arg16: memref<1x32xf32, #tpu.memory_space<vmem>>, %arg17: memref<1x8x32xf32, #tpu.memory_space<vmem>>) attributes {dimension_semantics = [#tpu.dimension_semantics<parallel>, #tpu.dimension_semantics<parallel>], iteration_bounds = array<i64: 2, 1>, scalar_prefetch = 0 : i64, scratch_operands = 0 : i64, tpu.core_type = #tpu.core_type<tc>, window_params = [{transform_indices = @transform_0, window_bounds = array<i64: 1, 8, 32>}, {pipeline_mode = #tpu.pipeline_mode<synchronous>, transform_indices = @transform_1, window_bounds = array<i64: 1, 32>}, {pipeline_mode = #tpu.pipeline_mode<synchronous>, transform_indices = @transform_2, window_bounds = array<i64: 1, 32>}, {pipeline_mode = #tpu.pipeline_mode<synchronous>, transform_indices = @transform_3, window_bounds = array<i64: 32, 32>}, {pipeline_mode = #tpu.pipeline_mode<synchronous>, transform_indices = @transform_4, window_bounds = array<i64: 1, 32>}, {pipeline_mode = #tpu.pipeline_mode<synchronous>, transform_indices = @transform_5, window_bounds = array<i64: 32, 64>}, {pipeline_mode = #tpu.pipeline_mode<synchronous>, transform_indices = @transform_6, window_bounds = array<i64: 1, 64>}, {pipeline_mode = #tpu.pipeline_mode<synchronous>, transform_indices = @transform_7, window_bounds = array<i64: 32, 32>}, {pipeline_mode = #tpu.pipeline_mode<synchronous>, transform_indices = @transform_8, window_bounds = array<i64: 1, 32>}, {pipeline_mode = #tpu.pipeline_mode<synchronous>, transform_indices = @transform_9, window_bounds = array<i64: 1, 32>}, {pipeline_mode = #tpu.pipeline_mode<synchronous>, transform_indices = @transform_10, window_bounds = array<i64: 1, 32>}, {pipeline_mode = #tpu.pipeline_mode<synchronous>, transform_indices = @transform_11, window_bounds = array<i64: 32, 128>}, {pipeline_mode = #tpu.pipeline_mode<synchronous>, transform_indices = @transform_12, window_bounds = array<i64: 1, 128>}, {pipeline_mode = #tpu.pipeline_mode<synchronous>, transform_indices = @transform_13, window_bounds = array<i64: 128, 32>}, {pipeline_mode = #tpu.pipeline_mode<synchronous>, transform_indices = @transform_14, window_bounds = array<i64: 1, 32>}, {transform_indices = @transform_15, window_bounds = array<i64: 1, 8, 32>}]} {
    %c8_i32 = arith.constant 8 : i32
    %0 = arith.muli %arg1, %c8_i32 : i32
    %1 = tpu.assume_multiple %0, 8 : i32
    %c0 = arith.constant 0 : index
    %c0_0 = arith.constant 0 : index
    %c0_1 = arith.constant 0 : index
    %2 = vector.load %arg2[%c0, %c0_0, %c0_1] : memref<1x8x32xf32, #tpu.memory_space<vmem>>, vector<1x8x32xf32>
    %3 = vector.shape_cast %2 : vector<1x8x32xf32> to vector<8x32xf32>
    %c0_2 = arith.constant 0 : index
    %4 = arith.index_cast %1 : i32 to index
    %c0_3 = arith.constant 0 : index
    %5 = vector.load %arg2[%c0_2, %4, %c0_3] : memref<1x8x32xf32, #tpu.memory_space<vmem>>, vector<1x8x32xf32>
    %6 = vector.shape_cast %5 : vector<1x8x32xf32> to vector<8x32xf32>
    %c0_4 = arith.constant 0 : index
    %c0_5 = arith.constant 0 : index
    %7 = vector.load %arg3[%c0_4, %c0_5] : memref<1x32xf32, #tpu.memory_space<vmem>>, vector<1x32xf32>
    %c0_6 = arith.constant 0 : index
    %c0_7 = arith.constant 0 : index
    %8 = vector.load %arg4[%c0_6, %c0_7] : memref<1x32xf32, #tpu.memory_space<vmem>>, vector<1x32xf32>
    %cst = arith.constant dense<0.000000e+00> : vector<8xf32>
    %9 = vector.multi_reduction <add>, %3, %cst [1] : vector<8x32xf32> to vector<8xf32>
    %10 = vector.shape_cast %9 : vector<8xf32> to vector<8x1xf32>
    %cst_8 = arith.constant 3.200000e+01 : f32
    %11 = vector.broadcast %cst_8 : f32 to vector<8x1xf32>
    %12 = arith.divf %10, %11 : vector<8x1xf32>
    %13 = vector.broadcast %12 : vector<8x1xf32> to vector<8x32xf32>
    %14 = arith.subf %3, %13 : vector<8x32xf32>
    %15 = arith.mulf %14, %14 : vector<8x32xf32>
    %cst_9 = arith.constant dense<0.000000e+00> : vector<8xf32>
    %16 = vector.multi_reduction <add>, %15, %cst_9 [1] : vector<8x32xf32> to vector<8xf32>
    %17 = vector.shape_cast %16 : vector<8xf32> to vector<8x1xf32>
    %cst_10 = arith.constant 3.200000e+01 : f32
    %18 = vector.broadcast %cst_10 : f32 to vector<8x1xf32>
    %19 = arith.divf %17, %18 : vector<8x1xf32>
    %20 = vector.broadcast %12 : vector<8x1xf32> to vector<8x32xf32>
    %21 = arith.subf %3, %20 : vector<8x32xf32>
    %cst_11 = arith.constant 9.99999974E-6 : f32
    %22 = vector.broadcast %cst_11 : f32 to vector<8x1xf32>
    %23 = arith.addf %19, %22 : vector<8x1xf32>
    %24 = math.rsqrt %23 : vector<8x1xf32>
    %25 = vector.broadcast %24 : vector<8x1xf32> to vector<8x32xf32>
    %26 = arith.mulf %21, %25 : vector<8x32xf32>
    %27 = vector.broadcast %7 : vector<1x32xf32> to vector<8x32xf32>
    %28 = arith.mulf %26, %27 : vector<8x32xf32>
    %29 = vector.broadcast %8 : vector<1x32xf32> to vector<8x32xf32>
    %30 = arith.addf %28, %29 : vector<8x32xf32>
    %cst_12 = arith.constant dense<0.000000e+00> : vector<8xf32>
    %31 = vector.multi_reduction <add>, %6, %cst_12 [1] : vector<8x32xf32> to vector<8xf32>
    %32 = vector.shape_cast %31 : vector<8xf32> to vector<8x1xf32>
    %cst_13 = arith.constant 3.200000e+01 : f32
    %33 = vector.broadcast %cst_13 : f32 to vector<8x1xf32>
    %34 = arith.divf %32, %33 : vector<8x1xf32>
    %35 = vector.broadcast %34 : vector<8x1xf32> to vector<8x32xf32>
    %36 = arith.subf %6, %35 : vector<8x32xf32>
    %37 = arith.mulf %36, %36 : vector<8x32xf32>
    %cst_14 = arith.constant dense<0.000000e+00> : vector<8xf32>
    %38 = vector.multi_reduction <add>, %37, %cst_14 [1] : vector<8x32xf32> to vector<8xf32>
    %39 = vector.shape_cast %38 : vector<8xf32> to vector<8x1xf32>
    %cst_15 = arith.constant 3.200000e+01 : f32
    %40 = vector.broadcast %cst_15 : f32 to vector<8x1xf32>
    %41 = arith.divf %39, %40 : vector<8x1xf32>
    %42 = vector.broadcast %34 : vector<8x1xf32> to vector<8x32xf32>
    %43 = arith.subf %6, %42 : vector<8x32xf32>
    %cst_16 = arith.constant 9.99999974E-6 : f32
    %44 = vector.broadcast %cst_16 : f32 to vector<8x1xf32>
    %45 = arith.addf %41, %44 : vector<8x1xf32>
    %46 = math.rsqrt %45 : vector<8x1xf32>
    %47 = vector.broadcast %46 : vector<8x1xf32> to vector<8x32xf32>
    %48 = arith.mulf %43, %47 : vector<8x32xf32>
    %49 = vector.broadcast %7 : vector<1x32xf32> to vector<8x32xf32>
    %50 = arith.mulf %48, %49 : vector<8x32xf32>
    %51 = vector.broadcast %8 : vector<1x32xf32> to vector<8x32xf32>
    %52 = arith.addf %50, %51 : vector<8x32xf32>
    %53 = arith.truncf %52 : vector<8x32xf32> to vector<8x32xbf16>
    %c0_17 = arith.constant 0 : index
    %c0_18 = arith.constant 0 : index
    %54 = vector.load %arg5[%c0_17, %c0_18] : memref<32x32xbf16, #tpu.memory_space<vmem>>, vector<32x32xbf16>
    %cst_19 = arith.constant dense<0.000000e+00> : vector<8x32xf32>
    %55 = tpu.matmul %53, %54, %cst_19 {dimension_numbers = #tpu.dot_dimension_numbers<[1], [0], [0], [1], [0, 0, 1, 1], [], []>} : vector<8x32xbf16>, vector<32x32xbf16>, vector<8x32xf32> -> vector<8x32xf32>
    %c0_20 = arith.constant 0 : index
    %c0_21 = arith.constant 0 : index
    %56 = vector.load %arg6[%c0_20, %c0_21] : memref<1x32xf32, #tpu.memory_space<vmem>>, vector<1x32xf32>
    %57 = vector.broadcast %56 : vector<1x32xf32> to vector<8x32xf32>
    %58 = arith.addf %55, %57 : vector<8x32xf32>
    %cst_22 = arith.constant 0.353553385 : f32
    %59 = vector.broadcast %cst_22 : f32 to vector<8x32xf32>
    %60 = arith.mulf %58, %59 : vector<8x32xf32>
    %61 = arith.truncf %60 : vector<8x32xf32> to vector<8x32xbf16>
    %62 = arith.truncf %30 : vector<8x32xf32> to vector<8x32xbf16>
    %c0_23 = arith.constant 0 : index
    %c0_24 = arith.constant 0 : index
    %63 = vector.load %arg7[%c0_23, %c0_24] : memref<32x64xbf16, #tpu.memory_space<vmem>>, vector<32x64xbf16>
    %cst_25 = arith.constant dense<0.000000e+00> : vector<8x64xf32>
    %64 = tpu.matmul %62, %63, %cst_25 {dimension_numbers = #tpu.dot_dimension_numbers<[1], [0], [0], [1], [0, 0, 1, 1], [], []>} : vector<8x32xbf16>, vector<32x64xbf16>, vector<8x64xf32> -> vector<8x64xf32>
    %c0_26 = arith.constant 0 : index
    %c0_27 = arith.constant 0 : index
    %65 = vector.load %arg8[%c0_26, %c0_27] : memref<1x64xf32, #tpu.memory_space<vmem>>, vector<1x64xf32>
    %66 = vector.broadcast %65 : vector<1x64xf32> to vector<8x64xf32>
    %67 = arith.addf %64, %66 : vector<8x64xf32>
    %68 = vector.extract_strided_slice %67 {offsets = [0, 0], sizes = [8, 32], strides = [1, 1]} : vector<8x64xf32> to vector<8x32xf32>
    %69 = arith.truncf %68 : vector<8x32xf32> to vector<8x32xbf16>
    %70 = vector.extract_strided_slice %67 {offsets = [0, 32], sizes = [8, 32], strides = [1, 1]} : vector<8x64xf32> to vector<8x32xf32>
    %71 = arith.truncf %70 : vector<8x32xf32> to vector<8x32xbf16>
    %72 = vector.extract_strided_slice %61 {offsets = [0, 0], sizes = [8, 8], strides = [1, 1]} : vector<8x32xbf16> to vector<8x8xbf16>
    %73 = vector.extract_strided_slice %69 {offsets = [0, 0], sizes = [8, 8], strides = [1, 1]} : vector<8x32xbf16> to vector<8x8xbf16>
    "tpu.trace_start"() <{level = 10 : i32, message = "qd,kd->qk"}> : () -> ()
    %cst_28 = arith.constant dense<0.000000e+00> : vector<8x8xf32>
    %74 = tpu.matmul %72, %73, %cst_28 {dimension_numbers = #tpu.dot_dimension_numbers<[1], [1], [0], [0], [0, 0, 1, 0], [], []>} : vector<8x8xbf16>, vector<8x8xbf16>, vector<8x8xf32> -> vector<8x8xf32>
    "tpu.trace_stop"() : () -> ()
    %cst_29 = arith.constant dense<0xFF800000> : vector<8xf32>
    %75 = vector.multi_reduction <maximumf>, %74, %cst_29 [1] : vector<8x8xf32> to vector<8xf32>
    %76 = vector.shape_cast %75 : vector<8xf32> to vector<8x1xf32>
    %77 = vector.broadcast %76 : vector<8x1xf32> to vector<8x8xf32>
    %78 = arith.subf %74, %77 : vector<8x8xf32>
    %79 = math.exp %78 : vector<8x8xf32>
    %cst_30 = arith.constant dense<0.000000e+00> : vector<8xf32>
    %80 = vector.multi_reduction <add>, %79, %cst_30 [1] : vector<8x8xf32> to vector<8xf32>
    %81 = vector.shape_cast %80 : vector<8xf32> to vector<8x1xf32>
    %82 = arith.truncf %79 : vector<8x8xf32> to vector<8x8xbf16>
    %83 = vector.extract_strided_slice %71 {offsets = [0, 0], sizes = [8, 8], strides = [1, 1]} : vector<8x32xbf16> to vector<8x8xbf16>
    %cst_31 = arith.constant dense<0.000000e+00> : vector<8x8xf32>
    %84 = tpu.matmul %82, %83, %cst_31 {dimension_numbers = #tpu.dot_dimension_numbers<[1], [0], [0], [1], [0, 0, 1, 1], [], []>} : vector<8x8xbf16>, vector<8x8xbf16>, vector<8x8xf32> -> vector<8x8xf32>
    %85 = tpu.reciprocal %81 {approx = true} : vector<8x1xf32> -> vector<8x1xf32>
    %86 = vector.broadcast %85 : vector<8x1xf32> to vector<8x8xf32>
    %87 = arith.mulf %84, %86 : vector<8x8xf32>
    %88 = vector.extract_strided_slice %61 {offsets = [0, 8], sizes = [8, 8], strides = [1, 1]} : vector<8x32xbf16> to vector<8x8xbf16>
    %89 = vector.extract_strided_slice %69 {offsets = [0, 8], sizes = [8, 8], strides = [1, 1]} : vector<8x32xbf16> to vector<8x8xbf16>
    "tpu.trace_start"() <{level = 10 : i32, message = "qd,kd->qk"}> : () -> ()
    %cst_32 = arith.constant dense<0.000000e+00> : vector<8x8xf32>
    %90 = tpu.matmul %88, %89, %cst_32 {dimension_numbers = #tpu.dot_dimension_numbers<[1], [1], [0], [0], [0, 0, 1, 0], [], []>} : vector<8x8xbf16>, vector<8x8xbf16>, vector<8x8xf32> -> vector<8x8xf32>
    "tpu.trace_stop"() : () -> ()
    %cst_33 = arith.constant dense<0xFF800000> : vector<8xf32>
    %91 = vector.multi_reduction <maximumf>, %90, %cst_33 [1] : vector<8x8xf32> to vector<8xf32>
    %92 = vector.shape_cast %91 : vector<8xf32> to vector<8x1xf32>
    %93 = vector.broadcast %92 : vector<8x1xf32> to vector<8x8xf32>
    %94 = arith.subf %90, %93 : vector<8x8xf32>
    %95 = math.exp %94 : vector<8x8xf32>
    %cst_34 = arith.constant dense<0.000000e+00> : vector<8xf32>
    %96 = vector.multi_reduction <add>, %95, %cst_34 [1] : vector<8x8xf32> to vector<8xf32>
    %97 = vector.shape_cast %96 : vector<8xf32> to vector<8x1xf32>
    %98 = arith.truncf %95 : vector<8x8xf32> to vector<8x8xbf16>
    %99 = vector.extract_strided_slice %71 {offsets = [0, 8], sizes = [8, 8], strides = [1, 1]} : vector<8x32xbf16> to vector<8x8xbf16>
    %cst_35 = arith.constant dense<0.000000e+00> : vector<8x8xf32>
    %100 = tpu.matmul %98, %99, %cst_35 {dimension_numbers = #tpu.dot_dimension_numbers<[1], [0], [0], [1], [0, 0, 1, 1], [], []>} : vector<8x8xbf16>, vector<8x8xbf16>, vector<8x8xf32> -> vector<8x8xf32>
    %101 = tpu.reciprocal %97 {approx = true} : vector<8x1xf32> -> vector<8x1xf32>
    %102 = vector.broadcast %101 : vector<8x1xf32> to vector<8x8xf32>
    %103 = arith.mulf %100, %102 : vector<8x8xf32>
    %104 = vector.extract_strided_slice %61 {offsets = [0, 16], sizes = [8, 8], strides = [1, 1]} : vector<8x32xbf16> to vector<8x8xbf16>
    %105 = vector.extract_strided_slice %69 {offsets = [0, 16], sizes = [8, 8], strides = [1, 1]} : vector<8x32xbf16> to vector<8x8xbf16>
    "tpu.trace_start"() <{level = 10 : i32, message = "qd,kd->qk"}> : () -> ()
    %cst_36 = arith.constant dense<0.000000e+00> : vector<8x8xf32>
    %106 = tpu.matmul %104, %105, %cst_36 {dimension_numbers = #tpu.dot_dimension_numbers<[1], [1], [0], [0], [0, 0, 1, 0], [], []>} : vector<8x8xbf16>, vector<8x8xbf16>, vector<8x8xf32> -> vector<8x8xf32>
    "tpu.trace_stop"() : () -> ()
    %cst_37 = arith.constant dense<0xFF800000> : vector<8xf32>
    %107 = vector.multi_reduction <maximumf>, %106, %cst_37 [1] : vector<8x8xf32> to vector<8xf32>
    %108 = vector.shape_cast %107 : vector<8xf32> to vector<8x1xf32>
    %109 = vector.broadcast %108 : vector<8x1xf32> to vector<8x8xf32>
    %110 = arith.subf %106, %109 : vector<8x8xf32>
    %111 = math.exp %110 : vector<8x8xf32>
    %cst_38 = arith.constant dense<0.000000e+00> : vector<8xf32>
    %112 = vector.multi_reduction <add>, %111, %cst_38 [1] : vector<8x8xf32> to vector<8xf32>
    %113 = vector.shape_cast %112 : vector<8xf32> to vector<8x1xf32>
    %114 = arith.truncf %111 : vector<8x8xf32> to vector<8x8xbf16>
    %115 = vector.extract_strided_slice %71 {offsets = [0, 16], sizes = [8, 8], strides = [1, 1]} : vector<8x32xbf16> to vector<8x8xbf16>
    %cst_39 = arith.constant dense<0.000000e+00> : vector<8x8xf32>
    %116 = tpu.matmul %114, %115, %cst_39 {dimension_numbers = #tpu.dot_dimension_numbers<[1], [0], [0], [1], [0, 0, 1, 1], [], []>} : vector<8x8xbf16>, vector<8x8xbf16>, vector<8x8xf32> -> vector<8x8xf32>
    %117 = tpu.reciprocal %113 {approx = true} : vector<8x1xf32> -> vector<8x1xf32>
    %118 = vector.broadcast %117 : vector<8x1xf32> to vector<8x8xf32>
    %119 = arith.mulf %116, %118 : vector<8x8xf32>
    %120 = vector.extract_strided_slice %61 {offsets = [0, 24], sizes = [8, 8], strides = [1, 1]} : vector<8x32xbf16> to vector<8x8xbf16>
    %121 = vector.extract_strided_slice %69 {offsets = [0, 24], sizes = [8, 8], strides = [1, 1]} : vector<8x32xbf16> to vector<8x8xbf16>
    "tpu.trace_start"() <{level = 10 : i32, message = "qd,kd->qk"}> : () -> ()
    %cst_40 = arith.constant dense<0.000000e+00> : vector<8x8xf32>
    %122 = tpu.matmul %120, %121, %cst_40 {dimension_numbers = #tpu.dot_dimension_numbers<[1], [1], [0], [0], [0, 0, 1, 0], [], []>} : vector<8x8xbf16>, vector<8x8xbf16>, vector<8x8xf32> -> vector<8x8xf32>
    "tpu.trace_stop"() : () -> ()
    %cst_41 = arith.constant dense<0xFF800000> : vector<8xf32>
    %123 = vector.multi_reduction <maximumf>, %122, %cst_41 [1] : vector<8x8xf32> to vector<8xf32>
    %124 = vector.shape_cast %123 : vector<8xf32> to vector<8x1xf32>
    %125 = vector.broadcast %124 : vector<8x1xf32> to vector<8x8xf32>
    %126 = arith.subf %122, %125 : vector<8x8xf32>
    %127 = math.exp %126 : vector<8x8xf32>
    %cst_42 = arith.constant dense<0.000000e+00> : vector<8xf32>
    %128 = vector.multi_reduction <add>, %127, %cst_42 [1] : vector<8x8xf32> to vector<8xf32>
    %129 = vector.shape_cast %128 : vector<8xf32> to vector<8x1xf32>
    %130 = arith.truncf %127 : vector<8x8xf32> to vector<8x8xbf16>
    %131 = vector.extract_strided_slice %71 {offsets = [0, 24], sizes = [8, 8], strides = [1, 1]} : vector<8x32xbf16> to vector<8x8xbf16>
    %cst_43 = arith.constant dense<0.000000e+00> : vector<8x8xf32>
    %132 = tpu.matmul %130, %131, %cst_43 {dimension_numbers = #tpu.dot_dimension_numbers<[1], [0], [0], [1], [0, 0, 1, 1], [], []>} : vector<8x8xbf16>, vector<8x8xbf16>, vector<8x8xf32> -> vector<8x8xf32>
    %133 = tpu.reciprocal %129 {approx = true} : vector<8x1xf32> -> vector<8x1xf32>
    %134 = vector.broadcast %133 : vector<8x1xf32> to vector<8x8xf32>
    %135 = arith.mulf %132, %134 : vector<8x8xf32>
    %136 = tpu.concatenate %87, %103, %119, %135 in 1 : vector<8x8xf32>, vector<8x8xf32>, vector<8x8xf32>, vector<8x8xf32> -> vector<8x32xf32>
    %137 = arith.truncf %136 : vector<8x32xf32> to vector<8x32xbf16>
    %c0_44 = arith.constant 0 : index
    %c0_45 = arith.constant 0 : index
    %138 = vector.load %arg9[%c0_44, %c0_45] : memref<32x32xbf16, #tpu.memory_space<vmem>>, vector<32x32xbf16>
    %cst_46 = arith.constant dense<0.000000e+00> : vector<8x32xf32>
    %139 = tpu.matmul %137, %138, %cst_46 {dimension_numbers = #tpu.dot_dimension_numbers<[1], [0], [0], [1], [0, 0, 1, 1], [], []>} : vector<8x32xbf16>, vector<32x32xbf16>, vector<8x32xf32> -> vector<8x32xf32>
    %c0_47 = arith.constant 0 : index
    %c0_48 = arith.constant 0 : index
    %140 = vector.load %arg10[%c0_47, %c0_48] : memref<1x32xf32, #tpu.memory_space<vmem>>, vector<1x32xf32>
    %141 = vector.broadcast %140 : vector<1x32xf32> to vector<8x32xf32>
    %142 = arith.addf %139, %141 : vector<8x32xf32>
    %143 = arith.addf %6, %142 : vector<8x32xf32>
    %c0_49 = arith.constant 0 : index
    %c0_50 = arith.constant 0 : index
    %144 = vector.load %arg11[%c0_49, %c0_50] : memref<1x32xf32, #tpu.memory_space<vmem>>, vector<1x32xf32>
    %c0_51 = arith.constant 0 : index
    %c0_52 = arith.constant 0 : index
    %145 = vector.load %arg12[%c0_51, %c0_52] : memref<1x32xf32, #tpu.memory_space<vmem>>, vector<1x32xf32>
    %cst_53 = arith.constant dense<0.000000e+00> : vector<8xf32>
    %146 = vector.multi_reduction <add>, %143, %cst_53 [1] : vector<8x32xf32> to vector<8xf32>
    %147 = vector.shape_cast %146 : vector<8xf32> to vector<8x1xf32>
    %cst_54 = arith.constant 3.200000e+01 : f32
    %148 = vector.broadcast %cst_54 : f32 to vector<8x1xf32>
    %149 = arith.divf %147, %148 : vector<8x1xf32>
    %150 = vector.broadcast %149 : vector<8x1xf32> to vector<8x32xf32>
    %151 = arith.subf %143, %150 : vector<8x32xf32>
    %152 = arith.mulf %151, %151 : vector<8x32xf32>
    %cst_55 = arith.constant dense<0.000000e+00> : vector<8xf32>
    %153 = vector.multi_reduction <add>, %152, %cst_55 [1] : vector<8x32xf32> to vector<8xf32>
    %154 = vector.shape_cast %153 : vector<8xf32> to vector<8x1xf32>
    %cst_56 = arith.constant 3.200000e+01 : f32
    %155 = vector.broadcast %cst_56 : f32 to vector<8x1xf32>
    %156 = arith.divf %154, %155 : vector<8x1xf32>
    %157 = vector.broadcast %149 : vector<8x1xf32> to vector<8x32xf32>
    %158 = arith.subf %143, %157 : vector<8x32xf32>
    %cst_57 = arith.constant 9.99999974E-6 : f32
    %159 = vector.broadcast %cst_57 : f32 to vector<8x1xf32>
    %160 = arith.addf %156, %159 : vector<8x1xf32>
    %161 = math.rsqrt %160 : vector<8x1xf32>
    %162 = vector.broadcast %161 : vector<8x1xf32> to vector<8x32xf32>
    %163 = arith.mulf %158, %162 : vector<8x32xf32>
    %164 = vector.broadcast %144 : vector<1x32xf32> to vector<8x32xf32>
    %165 = arith.mulf %163, %164 : vector<8x32xf32>
    %166 = vector.broadcast %145 : vector<1x32xf32> to vector<8x32xf32>
    %167 = arith.addf %165, %166 : vector<8x32xf32>
    %168 = arith.truncf %167 : vector<8x32xf32> to vector<8x32xbf16>
    %c0_58 = arith.constant 0 : index
    %c0_59 = arith.constant 0 : index
    %169 = vector.load %arg13[%c0_58, %c0_59] : memref<32x128xbf16, #tpu.memory_space<vmem>>, vector<32x128xbf16>
    %cst_60 = arith.constant dense<0.000000e+00> : vector<8x128xf32>
    %170 = tpu.matmul %168, %169, %cst_60 {dimension_numbers = #tpu.dot_dimension_numbers<[1], [0], [0], [1], [0, 0, 1, 1], [], []>} : vector<8x32xbf16>, vector<32x128xbf16>, vector<8x128xf32> -> vector<8x128xf32>
    %c0_61 = arith.constant 0 : index
    %c0_62 = arith.constant 0 : index
    %171 = vector.load %arg14[%c0_61, %c0_62] : memref<1x128xf32, #tpu.memory_space<vmem>>, vector<1x128xf32>
    %172 = vector.broadcast %171 : vector<1x128xf32> to vector<8x128xf32>
    %173 = arith.addf %170, %172 : vector<8x128xf32>
    %174 = arith.mulf %173, %173 : vector<8x128xf32>
    %175 = arith.mulf %173, %174 : vector<8x128xf32>
    %cst_63 = arith.constant 4.471500e-02 : f32
    %176 = vector.broadcast %cst_63 : f32 to vector<8x128xf32>
    %177 = arith.mulf %176, %175 : vector<8x128xf32>
    %178 = arith.addf %173, %177 : vector<8x128xf32>
    %cst_64 = arith.constant 0.797884583 : f32
    %179 = vector.broadcast %cst_64 : f32 to vector<8x128xf32>
    %180 = arith.mulf %179, %178 : vector<8x128xf32>
    %181 = math.tanh %180 : vector<8x128xf32>
    %cst_65 = arith.constant 1.000000e+00 : f32
    %182 = vector.broadcast %cst_65 : f32 to vector<8x128xf32>
    %183 = arith.addf %182, %181 : vector<8x128xf32>
    %cst_66 = arith.constant 5.000000e-01 : f32
    %184 = vector.broadcast %cst_66 : f32 to vector<8x128xf32>
    %185 = arith.mulf %184, %183 : vector<8x128xf32>
    %186 = arith.mulf %173, %185 : vector<8x128xf32>
    %187 = arith.truncf %186 : vector<8x128xf32> to vector<8x128xbf16>
    %c0_67 = arith.constant 0 : index
    %c0_68 = arith.constant 0 : index
    %188 = vector.load %arg15[%c0_67, %c0_68] : memref<128x32xbf16, #tpu.memory_space<vmem>>, vector<128x32xbf16>
    %cst_69 = arith.constant dense<0.000000e+00> : vector<8x32xf32>
    %189 = tpu.matmul %187, %188, %cst_69 {dimension_numbers = #tpu.dot_dimension_numbers<[1], [0], [0], [1], [0, 0, 1, 1], [], []>} : vector<8x128xbf16>, vector<128x32xbf16>, vector<8x32xf32> -> vector<8x32xf32>
    %c0_70 = arith.constant 0 : index
    %c0_71 = arith.constant 0 : index
    %190 = vector.load %arg16[%c0_70, %c0_71] : memref<1x32xf32, #tpu.memory_space<vmem>>, vector<1x32xf32>
    %191 = vector.broadcast %190 : vector<1x32xf32> to vector<8x32xf32>
    %192 = arith.addf %189, %191 : vector<8x32xf32>
    %193 = arith.addf %143, %192 : vector<8x32xf32>
    %c0_72 = arith.constant 0 : index
    %c0_73 = arith.constant 0 : index
    %c0_74 = arith.constant 0 : index
    %194 = vector.load %arg17[%c0_72, %c0_73, %c0_74] : memref<1x8x32xf32, #tpu.memory_space<vmem>>, vector<1x8x32xf32>
    %195 = vector.shape_cast %194 : vector<1x8x32xf32> to vector<8x32xf32>
    %196 = vector.shape_cast %193 : vector<8x32xf32> to vector<1x8x32xf32>
    tpu.vector_store %arg17[%c0_72, %c0_73, %c0_74], %196 {strides = array<i32>} : memref<1x8x32xf32, #tpu.memory_space<vmem>>, vector<1x8x32xf32>,
    return
  }
  func.func @transform_0(%arg0: i32, %arg1: i32) -> (i32, i32, i32) {
    %c0_i32 = arith.constant 0 : i32
    %c0_i32_0 = arith.constant 0 : i32
    %c0_i32_1 = arith.constant 0 : i32
    return %arg0, %c0_i32, %c0_i32_0 : i32, i32, i32
  }
  func.func @transform_1(%arg0: i32, %arg1: i32) -> (i32, i32) {
    %c0_i32 = arith.constant 0 : i32
    %c0_i32_0 = arith.constant 0 : i32
    %c0_i32_1 = arith.constant 0 : i32
    return %c0_i32, %c0_i32_0 : i32, i32
  }
  func.func @transform_2(%arg0: i32, %arg1: i32) -> (i32, i32) {
    %c0_i32 = arith.constant 0 : i32
    %c0_i32_0 = arith.constant 0 : i32
    %c0_i32_1 = arith.constant 0 : i32
    return %c0_i32, %c0_i32_0 : i32, i32
  }
  func.func @transform_3(%arg0: i32, %arg1: i32) -> (i32, i32) {
    %c0_i32 = arith.constant 0 : i32
    %c0_i32_0 = arith.constant 0 : i32
    %c0_i32_1 = arith.constant 0 : i32
    return %c0_i32, %c0_i32_0 : i32, i32
  }
  func.func @transform_4(%arg0: i32, %arg1: i32) -> (i32, i32) {
    %c0_i32 = arith.constant 0 : i32
    %c0_i32_0 = arith.constant 0 : i32
    %c0_i32_1 = arith.constant 0 : i32
    return %c0_i32, %c0_i32_0 : i32, i32
  }
  func.func @transform_5(%arg0: i32, %arg1: i32) -> (i32, i32) {
    %c0_i32 = arith.constant 0 : i32
    %c0_i32_0 = arith.constant 0 : i32
    %c0_i32_1 = arith.constant 0 : i32
    return %c0_i32, %c0_i32_0 : i32, i32
  }
  func.func @transform_6(%arg0: i32, %arg1: i32) -> (i32, i32) {
    %c0_i32 = arith.constant 0 : i32
    %c0_i32_0 = arith.constant 0 : i32
    %c0_i32_1 = arith.constant 0 : i32
    return %c0_i32, %c0_i32_0 : i32, i32
  }
  func.func @transform_7(%arg0: i32, %arg1: i32) -> (i32, i32) {
    %c0_i32 = arith.constant 0 : i32
    %c0_i32_0 = arith.constant 0 : i32
    %c0_i32_1 = arith.constant 0 : i32
    return %c0_i32, %c0_i32_0 : i32, i32
  }
  func.func @transform_8(%arg0: i32, %arg1: i32) -> (i32, i32) {
    %c0_i32 = arith.constant 0 : i32
    %c0_i32_0 = arith.constant 0 : i32
    %c0_i32_1 = arith.constant 0 : i32
    return %c0_i32, %c0_i32_0 : i32, i32
  }
  func.func @transform_9(%arg0: i32, %arg1: i32) -> (i32, i32) {
    %c0_i32 = arith.constant 0 : i32
    %c0_i32_0 = arith.constant 0 : i32
    %c0_i32_1 = arith.constant 0 : i32
    return %c0_i32, %c0_i32_0 : i32, i32
  }
  func.func @transform_10(%arg0: i32, %arg1: i32) -> (i32, i32) {
    %c0_i32 = arith.constant 0 : i32
    %c0_i32_0 = arith.constant 0 : i32
    %c0_i32_1 = arith.constant 0 : i32
    return %c0_i32, %c0_i32_0 : i32, i32
  }
  func.func @transform_11(%arg0: i32, %arg1: i32) -> (i32, i32) {
    %c0_i32 = arith.constant 0 : i32
    %c0_i32_0 = arith.constant 0 : i32
    %c0_i32_1 = arith.constant 0 : i32
    return %c0_i32, %c0_i32_0 : i32, i32
  }
  func.func @transform_12(%arg0: i32, %arg1: i32) -> (i32, i32) {
    %c0_i32 = arith.constant 0 : i32
    %c0_i32_0 = arith.constant 0 : i32
    %c0_i32_1 = arith.constant 0 : i32
    return %c0_i32, %c0_i32_0 : i32, i32
  }
  func.func @transform_13(%arg0: i32, %arg1: i32) -> (i32, i32) {
    %c0_i32 = arith.constant 0 : i32
    %c0_i32_0 = arith.constant 0 : i32
    %c0_i32_1 = arith.constant 0 : i32
    return %c0_i32, %c0_i32_0 : i32, i32
  }
  func.func @transform_14(%arg0: i32, %arg1: i32) -> (i32, i32) {
    %c0_i32 = arith.constant 0 : i32
    %c0_i32_0 = arith.constant 0 : i32
    %c0_i32_1 = arith.constant 0 : i32
    return %c0_i32, %c0_i32_0 : i32, i32
  }
  func.func @transform_15(%arg0: i32, %arg1: i32) -> (i32, i32, i32) {
    %c0_i32 = arith.constant 0 : i32
    %c0_i32_0 = arith.constant 0 : i32
    return %arg0, %arg1, %c0_i32 : i32, i32, i32
  }
}

</mosaic_0001>

<bundles_post_ra>
// kernel: tpu_custom_call.1
= control target key start
LH: loop header
LB: loop body
LE: loop exit
PB: predicated region body
PF: predicated region fallthrough
CT: control target
= control target key end

     0   :  { %s1867_s0 = inlined_call_operand.vmem [shape: f32[2,8,32], index: 0, kind: input, shape index: {}]   ;;  %s1868_s1 = inlined_call_operand.hbm [shape: f32[1,32], index: 1, kind: input, shape index: {}]   ;;  %s1869_s2 = inlined_call_operand.vmem [shape: f32[1,32], index: 2, kind: input, shape index: {}]   ;;  %s1870_s3 = inlined_call_operand.vmem [shape: bf16[32,32], index: 3, kind: input, shape index: {}]   ;;  %s1871_s4 = inlined_call_operand.vmem [shape: f32[1,32], index: 4, kind: input, shape index: {}]   ;;  %s1872_s5 = inlined_call_operand.vmem [shape: bf16[32,64], index: 5, kind: input, shape index: {}]   ;;  %s1873_s6 = inlined_call_operand.vmem [shape: f32[1,64], index: 6, kind: input, shape index: {}]   ;;  %s1874_s7 = inlined_call_operand.vmem [shape: bf16[32,32], index: 7, kind: input, shape index: {}]   ;;  %s1875_s8 = inlined_call_operand.vmem [shape: f32[1,32], index: 8, kind: input, shape index: {}]   ;;  %s1876_s9 = inlined_call_operand.vmem [shape: f32[1,32], index: 9, kind: input, shape index: {}]   ;;  %s1877_s10 = inlined_call_operand.vmem [shape: f32[1,32], index: 10, kind: input, shape index: {}]   ;;  %s1878_s11 = inlined_call_operand.vmem [shape: bf16[32,128], index: 11, kind: input, shape index: {}]   ;;  %s1879_s12 = inlined_call_operand.vmem [shape: f32[1,128], index: 12, kind: input, shape index: {}]   ;;  %s1880_s13 = inlined_call_operand.vmem [shape: bf16[128,32], index: 13, kind: input, shape index: {}]   ;;  %s1881_s14 = inlined_call_operand.vmem [shape: f32[1,32], index: 14, kind: input, shape index: {}]   ;;  %s1882_s15 = inlined_call_operand.hbm [shape: f32[2,8,32], index: 15, kind: output, shape index: {}]  }
   0x1   :  { %1888 = sst [smem:[#allocation11_spill]] %s1867_s0 }
   0x2   :  { %1889 = sst [smem:[#allocation12_spill]] %s1868_s1 }
   0x3   :  { %1890 = sst [smem:[#allocation13_spill]] %s1869_s2 }
   0x4   :  { %1891 = sst [smem:[#allocation14_spill]] %s1870_s3 }
   0x5   :  { %1892 = sst [smem:[#allocation15_spill]] %s1871_s4 }
   0x6   :  { %1893 = sst [smem:[#allocation16_spill]] %s1882_s15 }
   0x7   :  { %20 = vsyncpa [#allocation3], 0 }
   0x8   :  { %21 = vsyncpa [#allocation4], 0 }
   0x9   :  { %23 = vsyncpa [#allocation4 + $0x1], 0  ;;  %s1632_s18 = smov 0   ;;  %s1634_s19 = smov 0  }
   0xa   :  { %s1636_s20 = smov 0   ;;  %s1638_s21 = smov 0  }
   0xb   :  { %s1640_s22 = smov 0   ;;  %s1642_s23 = smov 0  }
   0xc LB: > { %1894 = sst [smem:[#allocation8_spill]] %s1518_s18  ;;  %s1209_s24 = sadd.s32 4294967295, %s1538_s23   ;;  %s1538_s23 = sphi %s1642_s23, %s29_s23   ;;  %s1534_s22 = sphi %s1640_s22, %s1912_s22   ;;  %s1530_s21 = sphi %s1638_s21, %s1911_s21   ;;  %s1526_s20 = sphi %s1636_s20, %s1910_s20   ;;  %s1522_s19 = sphi %s1634_s19, %s1909_s19   ;;  %s1518_s18 = sphi %s1632_s18, %s1908_s18  }
   0xd   : > { %s1210_s25 = sadd.s32 4294967294, %s1538_s23   ;;  %s41_s26 = sadd.s32 1, %s1534_s22 }
   0xe   : > { %s370_s27 = sadd.s32 1, %s1526_s20  ;;  %p43_p0 = scmp.ge.s32.totalorder %s41_s26, 2 }
   0xf   : > { %p380_p1 = scmp.ne.s32.totalorder %s1526_s20, %s1522_s19  ;;  %p381_p2 = scmp.eq.s32.totalorder %s1209_s24, 1 }
  0x10   : > { %p386_p3 = scmp.ne.s32.totalorder %s1522_s19, %s1518_s18  ;;  %s1914_s26 = smov (%p43_p0, %s41_s26), 0 }
  0x11   : > { %1895 = sst [smem:[#allocation9_spill]] %s1914_s26  ;;  %p1672_p4 = por %p381_p2, %p380_p1 }
  0x12   : > { %p387_p5 = scmp.eq.s32.totalorder %s1210_s25, 1  ;;  %s365_s29 = ssub.s32 %s1534_s22, %s1914_s26 }
  0x13   : > { %s1896_s28 = scalar_select %p1672_p4, 1, 0 }
  0x14   : > { %p1211_p6 = scmp.ge.s32.totalorder %s1538_s23, 1  ;;  %p368_p7 = scmp.eq.s32.totalorder %s365_s29, 0 }
  0x15   : > { %1897 = sst [smem:[#allocation10_spill]] %s1896_s28  ;;  %p1679_p8 = por %p387_p5, %p386_p3 }
  0x16   : > { %p394_p9 = scmp.lt.s32.totalorder %s1538_s23, 3  ;;  %p1328_p11 = scmp.eq.s32.totalorder %s1209_s24, 0 }
  0x17   : > { %s1685_s16 = scalar_select %p368_p7, %s1526_s20, %s370_s27  }
  0x18   : > { %p395_p10 = pnand %p1211_p6, %p394_p9  ;;  %s1899_s1 = sld [smem:[#allocation12_spill]] }
  0x19   : > { %s1540_s28 = smov [#allocation2]  }
  0x1a   : > { %p1320_p12 = pneg %p395_p10  ;;  %s408_s25 = sshll.u32 %s1540_s28, 4  ;;  %s409_s25 = int_to_ptr.vmem [resolvable:$true] %s408_s25 }
  0x1b   : > { %467 = sbr.rel (%p395_p10) target bundleno = 1791 (0x6ff), region = 80 }
  0x1c   : > { %p1321_p13 = pnand %p1328_p11, %p1320_p12 }
  0x1e   : > { %s406_s15 = sshll.u32 %s1899_s1, 4  ;;  %s407_s15 = int_to_ptr.hbm [resolvable:$true] %s406_s15 }
  0x1f   : > { %1323 = dma.hbm_to_vmem [thread:$0]  (!%p1321_p13), %s407_s15, 16, %s409_s25, [#allocation3]  }
  0x20   : > { %1509 = dma.done.wait (%p1328_p11), [#allocation3], 16  }
  0x21   : > { %1511 = vsyncadd (%p1328_p11), [#allocation3], 4294967280  ;;  %p515_p0 = scmp.lt.s32.totalorder %s1530_s21, 1  ;;  %s1900_s0 = sld [smem:[#allocation11_spill]]  ;;  %vm526_vm0 = vcmask 261120   ;;  %v1541_v2 = vmov 32.0  }
  0x22   : > { %1400 = vrcp.f32 %v1541_v2  ;;  %v1301_v19 = vld [vmem:[%s1872_s5 + $0x8] sm:$0xff]  ;;  %v1300_v20 = vld [vmem:[%s1872_s5] sm:$0xff]  ;;  %s1901_s3 = sld [smem:[#allocation14_spill]]  ;;  %vm665_vm8 = vcmask 64512   ;;  %s1544_s24 = smov 104   ;;  %vm703_vm9 = vcmask 1043456  }
  0x23   : > { %s516_s27 = scalar_select %p515_p0, %s1530_s21, 1  ;;  %657 = vmatpush.bf16.msra.mxu1 %v1301_v19  ;;  %v1391_v37 = vld [vmem:[#allocation2] ss:$0 sm:$0xff]  ;;  %vm906_vm10 = vcmask 130048   ;;  %vm908_vm11 = vcmask 195584  }
  0x24   : > { %s1902_s2 = sld [smem:[#allocation13_spill]]  ;;  %v1393_v53 = vld [vmem:[%s1873_s6] ss:$0 sm:$0xff]  ;;  %s1546_s15 = smov 88  }
  0x25   : > { %s1217_s29 = sshll.u32 %s516_s27, 3  ;;  %s1903_s4 = sld [smem:[#allocation15_spill]] }
  0x26   : > { %s1542_s27 = smov 112   ;;  %s1547_s26 = smov 80  }
  0x27   : > { %s518_s18 = scalar_lea.vmem %s1900_s0, %s1217_s29  ;;  %658 = vmatpush.bf16.msra.mxu1 %v1300_v20  ;;  %s1543_s29 = smov 120  }
  0x28   : > { %v1695_v0 = vld [vmem:[%s518_s18] sm:$0xff]  ;;  %v1401_v3 = vpop.eup %1400  ;;  %v1299_v21 = vld [vmem:[%s1901_s3 + $0x8] sm:$0xff]  ;;  %s1545_s18 = smov 96   ;;  %s1548_s28 = smov 72  }
  0x29   : > { %v527_v1 = vsel %vm526_vm0, %v1695_v0, 0.0  ;;  %v531_v4 = vmul.f32 32.0, %v1401_v3  ;;  %vm535_vm1 = vweird.f32 %v1401_v3  ;;  %618 = vmatpush.bf16.msra.mxu0 %v1299_v21  ;;  %v1298_v23 = vld [vmem:[%s1901_s3] sm:$0xff]  ;;  %s1549_s17 = smov 8   ;;  %s1550_s25 = smov 16  }
  0x2a   : > { %528 = vadd.xlane.f32.xlu0 %v527_v1  ;;  %v1392_v41 = vld [vmem:[%s1902_s2] ss:$0 sm:$0xff]  ;;  %s512_s0 = sand.u32 1, %s1522_s19  }
  0x2b   : > { %v532_v5 = vsub.f32 1.0, %v531_v4  ;;  %v1394_v59 = vld [vmem:[%s1903_s4] ss:$0 sm:$0xff] }
  0x2d   : > { %v533_v6 = vmul.f32 %v1401_v3, %v532_v5  ;;  %619 = vmatpush.bf16.msra.mxu0 %v1298_v23 }
  0x2f   : > { %v534_v7 = vadd.f32 %v1401_v3, %v533_v6 }
  0x31   : > { %v1699_v8 = vsel %vm535_vm1, %v1401_v3, %v534_v7 }
  0x32   : > { %565 = vadd.xlane.f32.xlu0 %v527_v1 }
  0x9d   : > { %v529_v9 = vpop.xlane.xlu0 %528 }
  0x9e   : > { %v537_v10 = vmul.f32 %v1699_v8, %v529_v9 }
  0xa0   : > { %v538_v11 = vsub.f32 %v1695_v0, %v537_v10 }
  0xa2   : > { %v539_v12 = vmul.f32 %v538_v11, %v538_v11 }
  0xa4   : > { %v540_v13 = vsel %vm526_vm0, %v539_v12, 0.0 }
  0xa5   : > { %541 = vadd.xlane.f32.xlu1 %v540_v13  ;;  %v566_v14 = vpop.xlane.xlu0 %565 }
  0xa6   : > { %v567_v15 = vmul.f32 %v566_v14, %v1699_v8 }
  0xa8   : > { %v568_v16 = vsub.f32 %v1695_v0, %v567_v15 }
  0xaa   : > { %v569_v17 = vmul.f32 %v568_v16, %v568_v16 }
  0xac   : > { %v570_v18 = vsel %vm526_vm0, %v569_v17, 0.0 }
  0xad   : > { %571 = vadd.xlane.f32.xlu1 %v570_v18 }
 0x118   : > { %v542_v22 = vpop.xlane.xlu1 %541 }
 0x119   : > { %v543_v24 = vmul.f32 %v542_v22, %v1699_v8 }
 0x11b   : > { %v544_v25 = vadd.f32 1e-05, %v543_v24 }
 0x11d   : > { %1402 = vrsqrt.f32 %v544_v25  ;;  %vm551_vm3 = vweird.f32 %v544_v25 }
 0x120   : > { %v572_v26 = vpop.xlane.xlu1 %571 }
 0x121   : > { %v573_v27 = vmul.f32 %v572_v26, %v1699_v8 }
 0x123   : > { %v1403_v28 = vpop.eup %1402  ;;  %v574_v29 = vadd.f32 1e-05, %v573_v27 }
 0x124   : > { %v546_v30 = vmul.f32 %v1403_v28, %v544_v25  ;;  %vm552_vm2 = vweird.f32 %v1403_v28 }
 0x125   : > { %1404 = vrsqrt.f32 %v574_v29  ;;  %vm553_vm4 = vmor %vm551_vm3, %vm552_vm2  ;;  %vm581_vm5 = vweird.f32 %v574_v29 }
 0x126   : > { %v547_v31 = vmul.f32 %v1403_v28, %v546_v30 }
 0x128   : > { %v548_v32 = vmul.f32 0.5, %v547_v31 }
 0x12a   : > { %v549_v33 = vsub.f32 1.5, %v548_v32 }
 0x12b   : > { %v1405_v34 = vpop.eup %1404 }
 0x12c   : > { %v550_v35 = vmul.f32 %v1403_v28, %v549_v33  ;;  %v576_v36 = vmul.f32 %v1405_v34, %v574_v29  ;;  %vm582_vm6 = vweird.f32 %v1405_v34 }
 0x12d   : > { %vm583_vm7 = vmor %vm581_vm5, %vm582_vm6 }
 0x12e   : > { %v554_v38 = vsel %vm553_vm4, %v1403_v28, %v550_v35  ;;  %v577_v39 = vmul.f32 %v1405_v34, %v576_v36 }
 0x12f   : > { %v555_v40 = vmul.f32 %v554_v38, %v538_v11 }
 0x130   : > { %v578_v42 = vmul.f32 0.5, %v577_v39 }
 0x131   : > { %v559_v43 = vmul.f32 %v1391_v37, %v555_v40 }
 0x132   : > { %v579_v44 = vsub.f32 1.5, %v578_v42 }
 0x133   : > { %v563_v45 = vadd.f32 %v1392_v41, %v559_v43 }
 0x134   : > { %v580_v46 = vmul.f32 %v1405_v34, %v579_v44 }
 0x135   : > { %v627_v47 = vpack.c.bf16 %v563_v45, %v563_v45 }
 0x136   : > { %v584_v48 = vsel %vm583_vm7, %v1405_v34, %v580_v46 }
 0x137   : > { %1235 = vmatmul.msk.bf16.vlgmr.msra.gmra.mxu1 %vm526_vm0, %v627_v47  ;;  %v585_v49 = vmul.f32 %v584_v48, %v568_v16 }
 0x139   : > { %v586_v50 = vmul.f32 %v1391_v37, %v585_v49 }
 0x13b   : > { %v587_v51 = vadd.f32 %v1392_v41, %v586_v50 }
 0x13d   : > { %v588_v52 = vpack.c.bf16 %v587_v51, %v587_v51 }
 0x13f   : > { %1226 = vmatmul.msk.bf16.vlgmr.msra.gmra.mxu0 %vm526_vm0, %v588_v52 }
 0x1b4   : > { %v660_v54 = vpop.f32.mrf.mxu1 }
 0x1b5   : > { %v661_v55 = vadd.f32 %v1393_v53, %v660_v54 }
 0x1b7   : > { %v664_v56 = vpack.c.bf16 %v661_v55, %v661_v55 }
 0x1b9   : > { %v696_v57 = vunpack.c.l.b16 %v664_v56  ;;  %v670_v58 = vsel %vm665_vm8, %v664_v56, 0 }
 0x1ba   : > { %679 = vmatpush.bf16.xpose.msra.mxu2 %v670_v58 }
 0x1bb   : > { %v1733_v60 = vpack.c.b16 %v696_v57, %v696_v57 }
 0x1bc   : > { %v621_v61 = vpop.f32.mrf.mxu0  ;;  %v662_v62 = vpop.f32.mrf.mxu1 }
 0x1bd   : > { %v622_v63 = vadd.f32 %v1394_v59, %v621_v61  ;;  %783 = vrot.lane.b32.xlu0 %v1733_v60, %s1542_s27  ;;  %727 = vrot.lane.b32.xlu2 %v1733_v60, %s1543_s29 }
 0x1be   : > { %839 = vrot.lane.b32.xlu1 %v1733_v60, %s1544_s24 }
 0x1bf   : > { %v625_v1 = vmul.f32 0.35355338, %v622_v63 }
 0x1c1   : > { %v626_v2 = vpack.c.bf16 %v625_v1, %v625_v1 }
 0x1c3   : > { %v723_v3 = vunpack.c.l.b16 %v626_v2  ;;  %1236 = vmatmul.msk.bf16.vlgmr.msra.gmra.mxu2 %vm665_vm8, %v626_v2 }
 0x1c4   : > { %v623_v4 = vpop.f32.mrf.mxu0 }
 0x1c5   : > { %698 = vrot.lane.b32.xlu0 %v1733_v60, %s1545_s18  ;;  %v724_v5 = vpack.c.b16 %v723_v3, %v723_v3 }
 0x1c7   : > { %725 = vrot.lane.b32.xlu2 %v724_v5, %s1543_s29 }
 0x1cf   : > { %781 = vrot.lane.b32.xlu2 %v724_v5, %s1542_s27  ;;  %s1551_s27 = smov 24  }
 0x1d7   : > { %837 = vrot.lane.b32.xlu2 %v724_v5, %s1544_s24  ;;  %s1904_s24 = sld [smem:[#allocation16_spill]] }
 0x217   : > { %v728_v6 = vpop.permute.xlu2 %727 }
 0x218   : > { %v733_v7 = vsel %vm665_vm8, %v728_v6, 0 }
 0x219   : > { %742 = vmatpush.bf16.xpose.msra.mxu3 %v733_v7 }
 0x221   : > { %v726_v9 = vpop.permute.xlu2 %725 }
 0x222   : > { %1238 = vmatmul.msk.bf16.vlgmr.msra.gmra.mxu3 %vm665_vm8, %v726_v9 }
 0x229   : > { %v782_v10 = vpop.permute.xlu2 %781 }
 0x22f   : > { %v784_v11 = vpop.permute.xlu0 %783 }
 0x230   : > { %v840_v12 = vpop.permute.xlu1 %839  ;;  %v789_v13 = vsel %vm665_vm8, %v784_v11, 0 }
 0x231   : > { %798 = vmatpush.bf16.xpose.msrb.mxu1 %v789_v13  ;;  %v845_v14 = vsel %vm665_vm8, %v840_v12, 0  ;;  %v838_v16 = vpop.permute.xlu2 %837 }
 0x232   : > { %854 = vmatpush.bf16.xpose.msrb.mxu3 %v845_v14 }
 0x237   : > { %v699_v15 = vpop.permute.xlu0 %698 }
 0x238   : > { %1240 = vmatmul.msk.bf16.vlgmr.msrb.gmra.mxu1 %vm665_vm8, %v782_v10  ;;  %v705_v17 = vsel %vm703_vm9, %v699_v15, 0  ;;  %v1303_v15 = vld [vmem:[%s1874_s7 + $0x8] sm:$0xff] }
 0x239   : > { %1242 = vmatmul.msk.bf16.vlgmr.msrb.gmra.mxu3 %vm665_vm8, %v838_v16  ;;  %714 = vmatpush.bf16.msrb.mxu0 %v705_v17  ;;  %v1302_v16 = vld [vmem:[%s1874_s7] sm:$0xff] }
 0x23a   : > { %940 = vmatpush.bf16.msra.mxu1 %v1303_v15 }
 0x23e   : > { %941 = vmatpush.bf16.msra.mxu1 %v1302_v16 }
 0x246   : > { %v681_v18 = vpop.f32.mrf.mxu2 }
 0x247   : > { %v685_v19 = vsel %vm665_vm8, %v681_v18, -inf }
 0x248   : > { %686 = vmax.xlane.f32.xlu2 %v685_v19 }
 0x24e   : > { %v683_v20 = vpop.f32.mrf.mxu2 }
 0x260   : > { %758 = vrot.lane.b32.xlu2 %v1733_v60, %s1546_s15 }
 0x2a5   : > { %v744_v21 = vpop.f32.mrf.mxu3 }
 0x2a6   : > { %v748_v22 = vsel %vm665_vm8, %v744_v21, -inf }
 0x2a7   : > { %749 = vmax.xlane.f32.xlu1 %v748_v22 }
 0x2ad   : > { %v746_v23 = vpop.f32.mrf.mxu3 }
 0x2b5   : > { %v800_v24 = vpop.f32.mrf.mxu1 }
 0x2b6   : > { %v804_v25 = vsel %vm665_vm8, %v800_v24, -inf }
 0x2b7   : > { %805 = vmax.xlane.f32.xlu0 %v804_v25 }
 0x2bb   : > { %v687_v26 = vpop.xlane.xlu2 %686 }
 0x2bc   : > { %v688_v27 = vsub.f32 %v681_v18, %v687_v26  ;;  %v856_v28 = vpop.f32.mrf.mxu3 }
 0x2bd   : > { %v860_v29 = vsel %vm665_vm8, %v856_v28, -inf  ;;  %v802_v30 = vpop.f32.mrf.mxu1 }
 0x2be   : > { %v689_v31 = vmul.f32 1.442695, %v688_v27  ;;  %861 = vmax.xlane.f32.xlu1 %v860_v29  ;;  %v1395_v27 = vld [vmem:[%s1875_s8] ss:$0 sm:$0xff] }
 0x2c0   : > { %1406 = vpow2.f32 %v689_v31 }
 0x2c3   : > { %v759_v32 = vpop.permute.xlu2 %758 }
 0x2c4   : > { %v764_v33 = vsel %vm703_vm9, %v759_v32, 0  ;;  %v858_v34 = vpop.f32.mrf.mxu3 }
 0x2c5   : > { %773 = vmatpush.bf16.msra.mxu0 %v764_v33 }
 0x2c6   : > { %v1407_v35 = vpop.eup %1406 }
 0x2c7   : > { %v694_v36 = vpack.c.bf16 %v1407_v35, %v1407_v35  ;;  %v691_v46 = vsel %vm665_vm8, %v1407_v35, 0.0 }
 0x2c9   : > { %1237 = vmatmul.msk.bf16.vlgmr.msrb.gmra.mxu0 %vm665_vm8, %v694_v36 }
 0x2cb   : > { %814 = vrot.lane.b32.xlu0 %v1733_v60, %s1547_s26  ;;  %s1216_s26 = sshll.u32 %s512_s0, 3 }
 0x2cc   : > { %s514_s1 = scalar_lea.vmem [#allocation5], %s1216_s26  ;;  %s1476_s26 = scalar_lea.hbm %s1904_s24, 16 }
 0x2cd   : > { %s1124_s2 = sshll.u32 %s514_s1, 4  ;;  %s1125_s2 = int_to_ptr.vmem [resolvable:$true] %s1124_s2 }
 0x2d7   : > { %870 = vrot.lane.b32.xlu1 %v1733_v60, %s1548_s28  ;;  %s1295_s28 = sshll.u32 %s1530_s21, 3  ;;  %s1111_s21 = scalar_lea.sflag [#allocation4], %s512_s0 }
 0x2d8   : > { %s1122_s15 = scalar_lea.hbm %s1904_s24, %s1295_s28 }
 0x2d9   : > { %s1126_s3 = sshll.u32 %s1122_s15, 4  ;;  %s1127_s3 = int_to_ptr.hbm [resolvable:$true] %s1126_s3 }
 0x2da   : > { %s1470_s4 = sshra.s32 %s1127_s3, 4  ;;  %s1471_s4 = int_to_ptr.hbm [resolvable:$true] %s1470_s4 }
 0x2db   : > { %p1477_p5 = scmp.lt.s32.totalorder %s1471_s4, %s1904_s24 }
 0x31a   : > { %v750_v37 = vpop.xlane.xlu1 %749 }
 0x31b   : > { %v751_v38 = vsub.f32 %v744_v21, %v750_v37 }
 0x31d   : > { %v752_v39 = vmul.f32 1.442695, %v751_v38  ;;  %v1305_v38 = vld [vmem:[%s1878_s11 + $0x8] sm:$0xff] }
 0x31f   : > { %1408 = vpow2.f32 %v752_v39  ;;  %v1313_v39 = vld [vmem:[%s1880_s13 + $0x38] sm:$0xff] }
 0x320   : > { %1095 = vmatpush.bf16.msra.mxu3 %v1313_v39 }
 0x325   : > { %v1409_v40 = vpop.eup %1408 }
 0x326   : > { %v757_v41 = vpack.c.bf16 %v1409_v40, %v1409_v40  ;;  %v754_v42 = vsel %vm665_vm8, %v1409_v40, 0.0 }
 0x327   : > { %755 = vadd.xlane.f32.xlu2 %v754_v42 }
 0x328   : > { %1239 = vmatmul.msk.bf16.vlgmr.msra.gmra.mxu0 %vm665_vm8, %v757_v41 }
 0x32a   : > { %v806_v43 = vpop.xlane.xlu0 %805 }
 0x32b   : > { %v807_v44 = vsub.f32 %v800_v24, %v806_v43 }
 0x32d   : > { %v808_v45 = vmul.f32 1.442695, %v807_v44 }
 0x32f   : > { %1410 = vpow2.f32 %v808_v45  ;;  %692 = vadd.xlane.f32.xlu2 %v691_v46 }
 0x331   : > { %v862_v47 = vpop.xlane.xlu1 %861 }
 0x332   : > { %v863_v48 = vsub.f32 %v856_v28, %v862_v47 }
 0x334   : > { %v864_v49 = vmul.f32 1.442695, %v863_v48 }
 0x335   : > { %v1411_v50 = vpop.eup %1410 }
 0x336   : > { %1412 = vpow2.f32 %v864_v49  ;;  %v810_v51 = vsel %vm665_vm8, %v1411_v50, 0.0  ;;  %v813_v56 = vpack.c.bf16 %v1411_v50, %v1411_v50  ;;  %v1396_v49 = vld [vmem:[%s1876_s9] ss:$0 sm:$0xff] }
 0x337   : > { %811 = vadd.xlane.f32.xlu0 %v810_v51 }
 0x33c   : > { %v1413_v52 = vpop.eup %1412 }
 0x33d   : > { %v866_v53 = vsel %vm665_vm8, %v1413_v52, 0.0  ;;  %v815_v54 = vpop.permute.xlu0 %814  ;;  %v869_v60 = vpack.c.bf16 %v1413_v52, %v1413_v52 }
 0x33e   : > { %867 = vadd.xlane.f32.xlu1 %v866_v53  ;;  %v820_v55 = vsel %vm703_vm9, %v815_v54, 0 }
 0x33f   : > { %829 = vmatpush.bf16.msrb.mxu2 %v820_v55  ;;  %v1312_v55 = vld [vmem:[%s1880_s13 + $0x30] sm:$0xff] }
 0x340   : > { %1096 = vmatpush.bf16.msra.mxu3 %v1312_v55 }
 0x342   : > { %1241 = vmatmul.msk.bf16.vlgmr.msrb.gmra.mxu2 %vm665_vm8, %v813_v56  ;;  %v1311_v56 = vld [vmem:[%s1880_s13 + $0x28] sm:$0xff] }
 0x343   : > { %1010 = vmatpush.bf16.msra.mxu2 %v1305_v38 }
 0x344   : > { %1097 = vmatpush.bf16.msra.mxu3 %v1311_v56 }
 0x346   : > { %v716_v57 = vpop.f32.mrf.mxu0 }
 0x349   : > { %v871_v58 = vpop.permute.xlu1 %870 }
 0x34a   : > { %v876_v59 = vsel %vm703_vm9, %v871_v58, 0  ;;  %v1309_v58 = vld [vmem:[%s1880_s13 + $0x18] sm:$0xff] }
 0x34b   : > { %885 = vmatpush.bf16.msrb.mxu0 %v876_v59  ;;  %v1308_v59 = vld [vmem:[%s1880_s13 + $0x10] sm:$0xff] }
 0x34e   : > { %1243 = vmatmul.msk.bf16.vlgmr.msrb.gmra.mxu0 %vm665_vm8, %v869_v60  ;;  %v718_v61 = vpop.f32.mrf.mxu0  ;;  %v1307_v60 = vld [vmem:[%s1880_s13 + $0x8] sm:$0xff] }
 0x34f   : > { %v1306_v61 = vld [vmem:[%s1880_s13] sm:$0xff] }
 0x39a   : > { %v756_v62 = vpop.xlane.xlu2 %755 }
 0x39b   : > { %1414 = vrcp.f32 %v756_v62  ;;  %v1398_v62 = vld [vmem:[%s1879_s12] ss:$0 sm:$0xff] }
 0x3a1   : > { %v1415_v63 = vpop.eup %1414 }
 0x3a2   : > { %v693_v17 = vpop.xlane.xlu2 %692 }
 0x3a5   : > { %v775_v1 = vpop.f32.mrf.mxu0 }
 0x3a6   : > { %v780_v2 = vmul.f32 %v1415_v63, %v775_v1 }
 0x3a8   : > { %894 = vrot.lane.b32.xlu2 %v780_v2, %s1549_s17  ;;  %s1472_s17 = scalar_lea.hbm %s1471_s4, 8 }
 0x3a9   : > { %p1473_p1 = scmp.ne.s32.totalorder %s1471_s4, %s1472_s17  ;;  %p1478_p6 = scmp.lt.s32.totalorder %s1476_s26, %s1472_s17 }
 0x3aa   : > { %v812_v4 = vpop.xlane.xlu0 %811 }
 0x3ab   : > { %1416 = vrcp.f32 %v812_v4  ;;  %p1474_p2 = pnand %p1473_p1, %p1672_p4  ;;  %p1479_p7 = por %p1478_p6, %p1477_p5 }
 0x3ad   : > { %v777_v3 = vpop.f32.mrf.mxu0  ;;  %p1475_p3 = pneg %p1474_p2 }
 0x3af   : > { %p1480_p9 = pnand %p1479_p7, %p1475_p3 }
 0x3b1   : > { %v868_v5 = vpop.xlane.xlu1 %867  ;;  %v1417_v6 = vpop.eup %1416 }
 0x3b2   : > { %1418 = vrcp.f32 %v868_v5 }
 0x3b3   : > { %1420 = vrcp.f32 %v693_v17 }
 0x3b8   : > { %v1419_v10 = vpop.eup %1418 }
 0x3b9   : > { %v1421_v18 = vpop.eup %1420 }
 0x3ba   : > { %v721_v20 = vmul.f32 %v1421_v18, %v716_v57  ;;  %v1310_v57 = vld [vmem:[%s1880_s13 + $0x20] sm:$0xff] }
 0x3bb   : > { %1098 = vmatpush.bf16.msra.mxu3 %v1310_v57 }
 0x3bf   : > { %1099 = vmatpush.bf16.msra.mxu3 %v1309_v58 }
 0x3c3   : > { %1100 = vmatpush.bf16.msra.mxu3 %v1308_v59 }
 0x3c5   : > { %v831_v7 = vpop.f32.mrf.mxu2 }
 0x3c6   : > { %v836_v9 = vmul.f32 %v1417_v6, %v831_v7 }
 0x3c7   : > { %1101 = vmatpush.bf16.msra.mxu3 %v1307_v60 }
 0x3c8   : > { %898 = vrot.lane.b32.xlu0 %v836_v9, %s1550_s25 }
 0x3cb   : > { %v887_v11 = vpop.f32.mrf.mxu0  ;;  %1102 = vmatpush.bf16.msra.mxu3 %v1306_v61 }
 0x3cc   : > { %v892_v12 = vmul.f32 %v1419_v10, %v887_v11 }
 0x3cd   : > { %v833_v13 = vpop.f32.mrf.mxu2 }
 0x3ce   : > { %902 = vrot.lane.b32.xlu1 %v892_v12, %s1551_s27 }
 0x3d3   : > { %v889_v14 = vpop.f32.mrf.mxu0 }
 0x3d4   : > { %v1399_v14 = vld [vmem:[%s1881_s14] ss:$0 sm:$0xff] }
 0x402   : > { %v895_v19 = vpop.permute.xlu2 %894 }
 0x403   : > { %v905_v22 = vsel %vm665_vm8, %v721_v20, %v895_v19 }
 0x43a   : > { %v899_v21 = vpop.permute.xlu0 %898 }
 0x43b   : > { %v907_v23 = vsel %vm906_vm10, %v905_v22, %v899_v21 }
 0x440   : > { %v903_v24 = vpop.permute.xlu1 %902 }
 0x441   : > { %v909_v25 = vsel %vm908_vm11, %v907_v23, %v903_v24 }
 0x442   : > { %v910_v26 = vpack.c.bf16 %v909_v25, %v909_v25 }
 0x444   : > { %1252 = vmatmul.msk.bf16.vlgmr.msra.gmra.mxu1 %vm526_vm0, %v910_v26 }
 0x4c1   : > { %v943_v28 = vpop.f32.mrf.mxu1 }
 0x4c2   : > { %v944_v29 = vadd.f32 %v1395_v27, %v943_v28 }
 0x4c4   : > { %v1777_v30 = vadd.f32 %v944_v29, %v1695_v0  ;;  %v1304_v0 = vld [vmem:[%s1878_s11] sm:$0xff] }
 0x4c5   : > { %1011 = vmatpush.bf16.msra.mxu2 %v1304_v0 }
 0x4c6   : > { %v950_v31 = vsel %vm526_vm0, %v1777_v30, 0.0 }
 0x4c7   : > { %951 = vadd.xlane.f32.xlu0 %v950_v31 }
 0x4c9   : > { %v945_v32 = vpop.f32.mrf.mxu1 }
 0x53a   : > { %v952_v33 = vpop.xlane.xlu0 %951 }
 0x53b   : > { %v953_v34 = vmul.f32 %v952_v33, %v1699_v8 }
 0x53d   : > { %v954_v35 = vsub.f32 %v1777_v30, %v953_v34 }
 0x53f   : > { %v955_v36 = vmul.f32 %v954_v35, %v954_v35 }
 0x541   : > { %v956_v37 = vsel %vm526_vm0, %v955_v36, 0.0 }
 0x542   : > { %957 = vadd.xlane.f32.xlu2 %v956_v37 }
 0x5b5   : > { %v958_v40 = vpop.xlane.xlu2 %957 }
 0x5b6   : > { %v959_v41 = vmul.f32 %v958_v40, %v1699_v8  ;;  %v1397_v8 = vld [vmem:[%s1877_s10] ss:$0 sm:$0xff] }
 0x5b8   : > { %v960_v42 = vadd.f32 1e-05, %v959_v41 }
 0x5ba   : > { %1422 = vrsqrt.f32 %v960_v42  ;;  %vm967_vm13 = vweird.f32 %v960_v42 }
 0x5c0   : > { %v1423_v43 = vpop.eup %1422 }
 0x5c1   : > { %v962_v44 = vmul.f32 %v1423_v43, %v960_v42  ;;  %vm968_vm12 = vweird.f32 %v1423_v43 }
 0x5c2   : > { %vm969_vm14 = vmor %vm967_vm13, %vm968_vm12 }
 0x5c3   : > { %v963_v45 = vmul.f32 %v1423_v43, %v962_v44 }
 0x5c5   : > { %v964_v46 = vmul.f32 0.5, %v963_v45 }
 0x5c7   : > { %v965_v47 = vsub.f32 1.5, %v964_v46 }
 0x5c9   : > { %v966_v48 = vmul.f32 %v1423_v43, %v965_v47 }
 0x5cb   : > { %v970_v50 = vsel %vm969_vm14, %v1423_v43, %v966_v48 }
 0x5cc   : > { %v971_v51 = vmul.f32 %v970_v50, %v954_v35 }
 0x5ce   : > { %v975_v52 = vmul.f32 %v1396_v49, %v971_v51 }
 0x5d0   : > { %v979_v53 = vadd.f32 %v1397_v8, %v975_v52 }
 0x5d2   : > { %v980_v54 = vpack.c.bf16 %v979_v53, %v979_v53 }
 0x5d4   : > { %1261 = vmatmul.msk.bf16.vlgmr.msra.gmra.mxu2 %vm526_vm0, %v980_v54 }
 0x657   : > { %v1013_v63 = vpop.f32.mrf.mxu2 }
 0x658   : > { %v1014_v1 = vadd.f32 %v1398_v62, %v1013_v63 }
 0x65a   : > { %v1017_v2 = vmul.f32 %v1014_v1, %v1014_v1 }
 0x65c   : > { %v1018_v3 = vmul.f32 %v1017_v2, %v1014_v1 }
 0x65e   : > { %v1019_v4 = vmul.f32 0.044715, %v1018_v3 }
 0x65f   : > { %v1015_v5 = vpop.f32.mrf.mxu2 }
 0x660   : > { %v1020_v6 = vadd.f32 %v1019_v4, %v1014_v1 }
 0x662   : > { %v1021_v7 = vmul.f32 0.7978846, %v1020_v6 }
 0x664   : > { %1424 = vtanh.f32 %v1021_v7 }
 0x66a   : > { %v1425_v9 = vpop.eup %1424 }
 0x66b   : > { %v1023_v10 = vadd.f32 1.0, %v1425_v9 }
 0x66d   : > { %v1024_v11 = vmul.f32 0.5, %v1023_v10 }
 0x66f   : > { %v1025_v12 = vmul.f32 %v1024_v11, %v1014_v1 }
 0x671   : > { %v1026_v13 = vpack.c.bf16 %v1025_v12, %v1025_v12 }
 0x673   : > { %1103 = vmatmul.bf16.vlgmr.msra.gmra.mxu3 %v1026_v13 }
 0x6f6   : > { %v1104_v15 = vpop.f32.mrf.mxu3 }
 0x6f7   : > { %v1105_v16 = vadd.f32 %v1399_v14, %v1104_v15 }
 0x6f9   : > { %v1108_v17 = vadd.f32 %v1105_v16, %v1777_v30 }
 0x6fb   : > { %1109 = vst.msk [vmem:[%s514_s1] sm:$0xff] %vm526_vm0, %v1108_v17 }
 0x6fc   : > { %1483 = shalt.err (!%p1480_p9)
}
 0x6fd   : > { %1318 = dma.vmem_to_hbm [thread:$0]  (%p1672_p4), %s1125_s2, 128, %s1127_s3, %s1111_s21  }
 0x6fe   : > { %v1106_v18 = vpop.f32.mrf.mxu3 }
 0x6ff PF: > { %s1906_s1 = sld [smem:[#allocation8_spill]]  ;;  %p1330_p10 = scmp.ge.s32.totalorder %s1538_s23, 2 }
 0x701   : > { %p1325_p11 = pnand %p1330_p10, %p1679_p8 }
 0x703   : > { %p1326_p12 = pneg %p1325_p11 }
 0x705   : > { %s1138_s0 = sand.u32 1, %s1906_s1  }
 0x706   : > { %s1139_s15 = scalar_lea.sflag [#allocation4], %s1138_s0 }
 0x707   : > { %1513 = dma.done.wait (%p1326_p12), %s1139_s15, 128  }
 0x708   : > { %1515 = vsyncadd (%p1326_p12), %s1139_s15, 4294967168  ;;  %s29_s23 = sadd.s32 1, %s1538_s23   ;;  %s1907_s2 = sld [smem:[#allocation9_spill]] }
 0x709   : > { %p26_p13 = scmp.ge.s32.totalorder %s29_s23, 4   ;;  %s1908_s18 = smov %s1522_s19 }
 0x70a   : > { %s1909_s19 = smov %s1526_s20  ;;  %s1910_s20 = smov %s1685_s16 }
 0x70b   : > { %s1911_s21 = smov %s1534_s22  ;;  %28 = sbr.rel (!%p26_p13) target bundleno = 12 (0xc), region = 121 }
 0x70e   : > { %s1912_s22 = smov %s1907_s2 }
 0x710   :  { %1145 = vsyncpa [#allocation3], 1 }
 0x711   :  { %1147 = vsyncpa [#allocation3 + $0x1], 1 }
 0x712   :  { %1148 = vsyncpa [#allocation4], 1 }
 0x713   :  { %1150 = vsyncpa [#allocation4 + $0x1], 1 }

// kernel: tpu_custom_call.1
= control target key start
LH: loop header
LB: loop body
LE: loop exit
PB: predicated region body
PF: predicated region fallthrough
CT: control target
= control target key end

     0   :  { %s1867_s0 = inlined_call_operand.vmem [shape: f32[2,8,32], index: 0, kind: input, shape index: {}]   ;;  %s1868_s1 = inlined_call_operand.hbm [shape: f32[1,32], index: 1, kind: input, shape index: {}]   ;;  %s1869_s2 = inlined_call_operand.vmem [shape: f32[1,32], index: 2, kind: input, shape index: {}]   ;;  %s1870_s3 = inlined_call_operand.vmem [shape: bf16[32,32], index: 3, kind: input, shape index: {}]   ;;  %s1871_s4 = inlined_call_operand.vmem [shape: f32[1,32], index: 4, kind: input, shape index: {}]   ;;  %s1872_s5 = inlined_call_operand.vmem [shape: bf16[32,64], index: 5, kind: input, shape index: {}]   ;;  %s1873_s6 = inlined_call_operand.vmem [shape: f32[1,64], index: 6, kind: input, shape index: {}]   ;;  %s1874_s7 = inlined_call_operand.vmem [shape: bf16[32,32], index: 7, kind: input, shape index: {}]   ;;  %s1875_s8 = inlined_call_operand.vmem [shape: f32[1,32], index: 8, kind: input, shape index: {}]   ;;  %s1876_s9 = inlined_call_operand.vmem [shape: f32[1,32], index: 9, kind: input, shape index: {}]   ;;  %s1877_s10 = inlined_call_operand.vmem [shape: f32[1,32], index: 10, kind: input, shape index: {}]   ;;  %s1878_s11 = inlined_call_operand.vmem [shape: bf16[32,128], index: 11, kind: input, shape index: {}]   ;;  %s1879_s12 = inlined_call_operand.vmem [shape: f32[1,128], index: 12, kind: input, shape index: {}]   ;;  %s1880_s13 = inlined_call_operand.vmem [shape: bf16[128,32], index: 13, kind: input, shape index: {}]   ;;  %s1881_s14 = inlined_call_operand.vmem [shape: f32[1,32], index: 14, kind: input, shape index: {}]   ;;  %s1882_s15 = inlined_call_operand.hbm [shape: f32[2,8,32], index: 15, kind: output, shape index: {}]  }
   0x1   :  { %1888 = sst [smem:[#allocation11_spill]] %s1867_s0 }
   0x2   :  { %1889 = sst [smem:[#allocation12_spill]] %s1868_s1 }
   0x3   :  { %1890 = sst [smem:[#allocation13_spill]] %s1869_s2 }
   0x4   :  { %1891 = sst [smem:[#allocation14_spill]] %s1870_s3 }
   0x5   :  { %1892 = sst [smem:[#allocation15_spill]] %s1871_s4 }
   0x6   :  { %1893 = sst [smem:[#allocation16_spill]] %s1882_s15 }
   0x7   :  { %20 = vsyncpa [#allocation3], 0 }
   0x8   :  { %21 = vsyncpa [#allocation4], 0 }
   0x9   :  { %23 = vsyncpa [#allocation4 + $0x1], 0  ;;  %s1632_s18 = smov 0   ;;  %s1634_s19 = smov 0  }
   0xa   :  { %s1636_s20 = smov 0   ;;  %s1638_s21 = smov 0  }
   0xb   :  { %s1640_s22 = smov 0   ;;  %s1642_s23 = smov 0  }
   0xc LB: > { %1894 = sst [smem:[#allocation8_spill]] %s1518_s18  ;;  %s1209_s24 = sadd.s32 4294967295, %s1538_s23   ;;  %s1538_s23 = sphi %s1642_s23, %s29_s23   ;;  %s1534_s22 = sphi %s1640_s22, %s1912_s22   ;;  %s1530_s21 = sphi %s1638_s21, %s1911_s21   ;;  %s1526_s20 = sphi %s1636_s20, %s1910_s20   ;;  %s1522_s19 = sphi %s1634_s19, %s1909_s19   ;;  %s1518_s18 = sphi %s1632_s18, %s1908_s18  }
   0xd   : > { %s1210_s25 = sadd.s32 4294967294, %s1538_s23   ;;  %s41_s26 = sadd.s32 1, %s1534_s22 }
   0xe   : > { %s370_s27 = sadd.s32 1, %s1526_s20  ;;  %p43_p0 = scmp.ge.s32.totalorder %s41_s26, 2 }
   0xf   : > { %p380_p1 = scmp.ne.s32.totalorder %s1526_s20, %s1522_s19  ;;  %p381_p2 = scmp.eq.s32.totalorder %s1209_s24, 1 }
  0x10   : > { %p386_p3 = scmp.ne.s32.totalorder %s1522_s19, %s1518_s18  ;;  %s1914_s26 = smov (%p43_p0, %s41_s26), 0 }
  0x11   : > { %1895 = sst [smem:[#allocation9_spill]] %s1914_s26  ;;  %p1672_p4 = por %p381_p2, %p380_p1 }
  0x12   : > { %p387_p5 = scmp.eq.s32.totalorder %s1210_s25, 1  ;;  %s365_s29 = ssub.s32 %s1534_s22, %s1914_s26 }
  0x13   : > { %s1896_s28 = scalar_select %p1672_p4, 1, 0 }
  0x14   : > { %p1211_p6 = scmp.ge.s32.totalorder %s1538_s23, 1  ;;  %p368_p7 = scmp.eq.s32.totalorder %s365_s29, 0 }
  0x15   : > { %1897 = sst [smem:[#allocation10_spill]] %s1896_s28  ;;  %p1679_p8 = por %p387_p5, %p386_p3 }
  0x16   : > { %p394_p9 = scmp.lt.s32.totalorder %s1538_s23, 3  ;;  %p1328_p11 = scmp.eq.s32.totalorder %s1209_s24, 0 }
  0x17   : > { %s1685_s16 = scalar_select %p368_p7, %s1526_s20, %s370_s27  }
  0x18   : > { %p395_p10 = pnand %p1211_p6, %p394_p9  ;;  %s1899_s1 = sld [smem:[#allocation12_spill]] }
  0x19   : > { %s1540_s28 = smov [#allocation2]  }
  0x1a   : > { %p1320_p12 = pneg %p395_p10  ;;  %s408_s25 = sshll.u32 %s1540_s28, 4  ;;  %s409_s25 = int_to_ptr.vmem [resolvable:$true] %s408_s25 }
  0x1b   : > { %467 = sbr.rel (%p395_p10) target bundleno = 1791 (0x6ff), region = 80 }
  0x1c   : > { %p1321_p13 = pnand %p1328_p11, %p1320_p12 }
  0x1e   : > { %s406_s15 = sshll.u32 %s1899_s1, 4  ;;  %s407_s15 = int_to_ptr.hbm [resolvable:$true] %s406_s15 }
  0x1f   : > { %1323 = dma.hbm_to_vmem [thread:$0]  (!%p1321_p13), %s407_s15, 16, %s409_s25, [#allocation3]  }
  0x20   : > { %1509 = dma.done.wait (%p1328_p11), [#allocation3], 16  }
  0x21   : > { %1511 = vsyncadd (%p1328_p11), [#allocation3], 4294967280  ;;  %p515_p0 = scmp.lt.s32.totalorder %s1530_s21, 1  ;;  %s1900_s0 = sld [smem:[#allocation11_spill]]  ;;  %vm526_vm0 = vcmask 261120   ;;  %v1541_v2 = vmov 32.0  }
  0x22   : > { %1400 = vrcp.f32 %v1541_v2  ;;  %v1301_v19 = vld [vmem:[%s1872_s5 + $0x8] sm:$0xff]  ;;  %v1300_v20 = vld [vmem:[%s1872_s5] sm:$0xff]  ;;  %s1901_s3 = sld [smem:[#allocation14_spill]]  ;;  %vm665_vm8 = vcmask 64512   ;;  %s1544_s24 = smov 104   ;;  %vm703_vm9 = vcmask 1043456  }
  0x23   : > { %s516_s27 = scalar_select %p515_p0, %s1530_s21, 1  ;;  %657 = vmatpush.bf16.msra.mxu1 %v1301_v19  ;;  %v1391_v37 = vld [vmem:[#allocation2] ss:$0 sm:$0xff]  ;;  %vm906_vm10 = vcmask 130048   ;;  %vm908_vm11 = vcmask 195584  }
  0x24   : > { %s1902_s2 = sld [smem:[#allocation13_spill]]  ;;  %v1393_v53 = vld [vmem:[%s1873_s6] ss:$0 sm:$0xff]  ;;  %s1546_s15 = smov 88  }
  0x25   : > { %s1217_s29 = sshll.u32 %s516_s27, 3  ;;  %s1903_s4 = sld [smem:[#allocation15_spill]] }
  0x26   : > { %s1542_s27 = smov 112   ;;  %s1547_s26 = smov 80  }
  0x27   : > { %s518_s18 = scalar_lea.vmem %s1900_s0, %s1217_s29  ;;  %658 = vmatpush.bf16.msra.mxu1 %v1300_v20  ;;  %s1543_s29 = smov 120  }
  0x28   : > { %v1695_v0 = vld [vmem:[%s518_s18] sm:$0xff]  ;;  %v1401_v3 = vpop.eup %1400  ;;  %v1299_v21 = vld [vmem:[%s1901_s3 + $0x8] sm:$0xff]  ;;  %s1545_s18 = smov 96   ;;  %s1548_s28 = smov 72  }
  0x29   : > { %v527_v1 = vsel %vm526_vm0, %v1695_v0, 0.0  ;;  %v531_v4 = vmul.f32 32.0, %v1401_v3  ;;  %vm535_vm1 = vweird.f32 %v1401_v3  ;;  %618 = vmatpush.bf16.msra.mxu0 %v1299_v21  ;;  %v1298_v23 = vld [vmem:[%s1901_s3] sm:$0xff]  ;;  %s1549_s17 = smov 8   ;;  %s1550_s25 = smov 16  }
  0x2a   : > { %528 = vadd.xlane.f32.xlu0 %v527_v1  ;;  %v1392_v41 = vld [vmem:[%s1902_s2] ss:$0 sm:$0xff]  ;;  %s512_s0 = sand.u32 1, %s1522_s19  }
  0x2b   : > { %v532_v5 = vsub.f32 1.0, %v531_v4  ;;  %v1394_v59 = vld [vmem:[%s1903_s4] ss:$0 sm:$0xff] }
  0x2d   : > { %v533_v6 = vmul.f32 %v1401_v3, %v532_v5  ;;  %619 = vmatpush.bf16.msra.mxu0 %v1298_v23 }
  0x2f   : > { %v534_v7 = vadd.f32 %v1401_v3, %v533_v6 }
  0x31   : > { %v1699_v8 = vsel %vm535_vm1, %v1401_v3, %v534_v7 }
  0x32   : > { %565 = vadd.xlane.f32.xlu0 %v527_v1 }
  0x9d   : > { %v529_v9 = vpop.xlane.xlu0 %528 }
  0x9e   : > { %v537_v10 = vmul.f32 %v1699_v8, %v529_v9 }
  0xa0   : > { %v538_v11 = vsub.f32 %v1695_v0, %v537_v10 }
  0xa2   : > { %v539_v12 = vmul.f32 %v538_v11, %v538_v11 }
  0xa4   : > { %v540_v13 = vsel %vm526_vm0, %v539_v12, 0.0 }
  0xa5   : > { %541 = vadd.xlane.f32.xlu1 %v540_v13  ;;  %v566_v14 = vpop.xlane.xlu0 %565 }
  0xa6   : > { %v567_v15 = vmul.f32 %v566_v14, %v1699_v8 }
  0xa8   : > { %v568_v16 = vsub.f32 %v1695_v0, %v567_v15 }
  0xaa   : > { %v569_v17 = vmul.f32 %v568_v16, %v568_v16 }
  0xac   : > { %v570_v18 = vsel %vm526_vm0, %v569_v17, 0.0 }
  0xad   : > { %571 = vadd.xlane.f32.xlu1 %v570_v18 }
 0x118   : > { %v542_v22 = vpop.xlane.xlu1 %541 }
 0x119   : > { %v543_v24 = vmul.f32 %v542_v22, %v1699_v8 }
 0x11b   : > { %v544_v25 = vadd.f32 1e-05, %v543_v24 }
 0x11d   : > { %1402 = vrsqrt.f32 %v544_v25  ;;  %vm551_vm3 = vweird.f32 %v544_v25 }
 0x120   : > { %v572_v26 = vpop.xlane.xlu1 %571 }
 0x121   : > { %v573_v27 = vmul.f32 %v572_v26, %v1699_v8 }
 0x123   : > { %v1403_v28 = vpop.eup %1402  ;;  %v574_v29 = vadd.f32 1e-05, %v573_v27 }
 0x124   : > { %v546_v30 = vmul.f32 %v1403_v28, %v544_v25  ;;  %vm552_vm2 = vweird.f32 %v1403_v28 }
 0x125   : > { %1404 = vrsqrt.f32 %v574_v29  ;;  %vm553_vm4 = vmor %vm551_vm3, %vm552_vm2  ;;  %vm581_vm5 = vweird.f32 %v574_v29 }
 0x126   : > { %v547_v31 = vmul.f32 %v1403_v28, %v546_v30 }
 0x128   : > { %v548_v32 = vmul.f32 0.5, %v547_v31 }
 0x12a   : > { %v549_v33 = vsub.f32 1.5, %v548_v32 }
 0x12b   : > { %v1405_v34 = vpop.eup %1404 }
 0x12c   : > { %v550_v35 = vmul.f32 %v1403_v28, %v549_v33  ;;  %v576_v36 = vmul.f32 %v1405_v34, %v574_v29  ;;  %vm582_vm6 = vweird.f32 %v1405_v34 }
 0x12d   : > { %vm583_vm7 = vmor %vm581_vm5, %vm582_vm6 }
 0x12e   : > { %v554_v38 = vsel %vm553_vm4, %v1403_v28, %v550_v35  ;;  %v577_v39 = vmul.f32 %v1405_v34, %v576_v36 }
 0x12f   : > { %v555_v40 = vmul.f32 %v554_v38, %v538_v11 }
 0x130   : > { %v578_v42 = vmul.f32 0.5, %v577_v39 }
 0x131   : > { %v559_v43 = vmul.f32 %v1391_v37, %v555_v40 }
 0x132   : > { %v579_v44 = vsub.f32 1.5, %v578_v42 }
 0x133   : > { %v563_v45 = vadd.f32 %v1392_v41, %v559_v43 }
 0x134   : > { %v580_v46 = vmul.f32 %v1405_v34, %v579_v44 }
 0x135   : > { %v627_v47 = vpack.c.bf16 %v563_v45, %v563_v45 }
 0x136   : > { %v584_v48 = vsel %vm583_vm7, %v1405_v34, %v580_v46 }
 0x137   : > { %1235 = vmatmul.msk.bf16.vlgmr.msra.gmra.mxu1 %vm526_vm0, %v627_v47  ;;  %v585_v49 = vmul.f32 %v584_v48, %v568_v16 }
 0x139   : > { %v586_v50 = vmul.f32 %v1391_v37, %v585_v49 }
 0x13b   : > { %v587_v51 = vadd.f32 %v1392_v41, %v586_v50 }
 0x13d   : > { %v588_v52 = vpack.c.bf16 %v587_v51, %v587_v51 }
 0x13f   : > { %1226 = vmatmul.msk.bf16.vlgmr.msra.gmra.mxu0 %vm526_vm0, %v588_v52 }
 0x1b4   : > { %v660_v54 = vpop.f32.mrf.mxu1 }
 0x1b5   : > { %v661_v55 = vadd.f32 %v1393_v53, %v660_v54 }
 0x1b7   : > { %v664_v56 = vpack.c.bf16 %v661_v55, %v661_v55 }
 0x1b9   : > { %v696_v57 = vunpack.c.l.b16 %v664_v56  ;;  %v670_v58 = vsel %vm665_vm8, %v664_v56, 0 }
 0x1ba   : > { %679 = vmatpush.bf16.xpose.msra.mxu2 %v670_v58 }
 0x1bb   : > { %v1733_v60 = vpack.c.b16 %v696_v57, %v696_v57 }
 0x1bc   : > { %v621_v61 = vpop.f32.mrf.mxu0  ;;  %v662_v62 = vpop.f32.mrf.mxu1 }
 0x1bd   : > { %v622_v63 = vadd.f32 %v1394_v59, %v621_v61  ;;  %783 = vrot.lane.b32.xlu0 %v1733_v60, %s1542_s27  ;;  %727 = vrot.lane.b32.xlu2 %v1733_v60, %s1543_s29 }
 0x1be   : > { %839 = vrot.lane.b32.xlu1 %v1733_v60, %s1544_s24 }
 0x1bf   : > { %v625_v1 = vmul.f32 0.35355338, %v622_v63 }
 0x1c1   : > { %v626_v2 = vpack.c.bf16 %v625_v1, %v625_v1 }
 0x1c3   : > { %v723_v3 = vunpack.c.l.b16 %v626_v2  ;;  %1236 = vmatmul.msk.bf16.vlgmr.msra.gmra.mxu2 %vm665_vm8, %v626_v2 }
 0x1c4   : > { %v623_v4 = vpop.f32.mrf.mxu0 }
 0x1c5   : > { %698 = vrot.lane.b32.xlu0 %v1733_v60, %s1545_s18  ;;  %v724_v5 = vpack.c.b16 %v723_v3, %v723_v3 }
 0x1c7   : > { %725 = vrot.lane.b32.xlu2 %v724_v5, %s1543_s29 }
 0x1cf   : > { %781 = vrot.lane.b32.xlu2 %v724_v5, %s1542_s27  ;;  %s1551_s27 = smov 24  }
 0x1d7   : > { %837 = vrot.lane.b32.xlu2 %v724_v5, %s1544_s24  ;;  %s1904_s24 = sld [smem:[#allocation16_spill]] }
 0x217   : > { %v728_v6 = vpop.permute.xlu2 %727 }
 0x218   : > { %v733_v7 = vsel %vm665_vm8, %v728_v6, 0 }
 0x219   : > { %742 = vmatpush.bf16.xpose.msra.mxu3 %v733_v7 }
 0x221   : > { %v726_v9 = vpop.permute.xlu2 %725 }
 0x222   : > { %1238 = vmatmul.msk.bf16.vlgmr.msra.gmra.mxu3 %vm665_vm8, %v726_v9 }
 0x229   : > { %v782_v10 = vpop.permute.xlu2 %781 }
 0x22f   : > { %v784_v11 = vpop.permute.xlu0 %783 }
 0x230   : > { %v840_v12 = vpop.permute.xlu1 %839  ;;  %v789_v13 = vsel %vm665_vm8, %v784_v11, 0 }
 0x231   : > { %798 = vmatpush.bf16.xpose.msrb.mxu1 %v789_v13  ;;  %v845_v14 = vsel %vm665_vm8, %v840_v12, 0  ;;  %v838_v16 = vpop.permute.xlu2 %837 }
 0x232   : > { %854 = vmatpush.bf16.xpose.msrb.mxu3 %v845_v14 }
 0x237   : > { %v699_v15 = vpop.permute.xlu0 %698 }
 0x238   : > { %1240 = vmatmul.msk.bf16.vlgmr.msrb.gmra.mxu1 %vm665_vm8, %v782_v10  ;;  %v705_v17 = vsel %vm703_vm9, %v699_v15, 0  ;;  %v1303_v15 = vld [vmem:[%s1874_s7 + $0x8] sm:$0xff] }
 0x239   : > { %1242 = vmatmul.msk.bf16.vlgmr.msrb.gmra.mxu3 %vm665_vm8, %v838_v16  ;;  %714 = vmatpush.bf16.msrb.mxu0 %v705_v17  ;;  %v1302_v16 = vld [vmem:[%s1874_s7] sm:$0xff] }
 0x23a   : > { %940 = vmatpush.bf16.msra.mxu1 %v1303_v15 }
 0x23e   : > { %941 = vmatpush.bf16.msra.mxu1 %v1302_v16 }
 0x246   : > { %v681_v18 = vpop.f32.mrf.mxu2 }
 0x247   : > { %v685_v19 = vsel %vm665_vm8, %v681_v18, -inf }
 0x248   : > { %686 = vmax.xlane.f32.xlu2 %v685_v19 }
 0x24e   : > { %v683_v20 = vpop.f32.mrf.mxu2 }
 0x260   : > { %758 = vrot.lane.b32.xlu2 %v1733_v60, %s1546_s15 }
 0x2a5   : > { %v744_v21 = vpop.f32.mrf.mxu3 }
 0x2a6   : > { %v748_v22 = vsel %vm665_vm8, %v744_v21, -inf }
 0x2a7   : > { %749 = vmax.xlane.f32.xlu1 %v748_v22 }
 0x2ad   : > { %v746_v23 = vpop.f32.mrf.mxu3 }
 0x2b5   : > { %v800_v24 = vpop.f32.mrf.mxu1 }
 0x2b6   : > { %v804_v25 = vsel %vm665_vm8, %v800_v24, -inf }
 0x2b7   : > { %805 = vmax.xlane.f32.xlu0 %v804_v25 }
 0x2bb   : > { %v687_v26 = vpop.xlane.xlu2 %686 }
 0x2bc   : > { %v688_v27 = vsub.f32 %v681_v18, %v687_v26  ;;  %v856_v28 = vpop.f32.mrf.mxu3 }
 0x2bd   : > { %v860_v29 = vsel %vm665_vm8, %v856_v28, -inf  ;;  %v802_v30 = vpop.f32.mrf.mxu1 }
 0x2be   : > { %v689_v31 = vmul.f32 1.442695, %v688_v27  ;;  %861 = vmax.xlane.f32.xlu1 %v860_v29  ;;  %v1395_v27 = vld [vmem:[%s1875_s8] ss:$0 sm:$0xff] }
 0x2c0   : > { %1406 = vpow2.f32 %v689_v31 }
 0x2c3   : > { %v759_v32 = vpop.permute.xlu2 %758 }
 0x2c4   : > { %v764_v33 = vsel %vm703_vm9, %v759_v32, 0  ;;  %v858_v34 = vpop.f32.mrf.mxu3 }
 0x2c5   : > { %773 = vmatpush.bf16.msra.mxu0 %v764_v33 }
 0x2c6   : > { %v1407_v35 = vpop.eup %1406 }
 0x2c7   : > { %v694_v36 = vpack.c.bf16 %v1407_v35, %v1407_v35  ;;  %v691_v46 = vsel %vm665_vm8, %v1407_v35, 0.0 }
 0x2c9   : > { %1237 = vmatmul.msk.bf16.vlgmr.msrb.gmra.mxu0 %vm665_vm8, %v694_v36 }
 0x2cb   : > { %814 = vrot.lane.b32.xlu0 %v1733_v60, %s1547_s26  ;;  %s1216_s26 = sshll.u32 %s512_s0, 3 }
 0x2cc   : > { %s514_s1 = scalar_lea.vmem [#allocation5], %s1216_s26  ;;  %s1476_s26 = scalar_lea.hbm %s1904_s24, 16 }
 0x2cd   : > { %s1124_s2 = sshll.u32 %s514_s1, 4  ;;  %s1125_s2 = int_to_ptr.vmem [resolvable:$true] %s1124_s2 }
 0x2d7   : > { %870 = vrot.lane.b32.xlu1 %v1733_v60, %s1548_s28  ;;  %s1295_s28 = sshll.u32 %s1530_s21, 3  ;;  %s1111_s21 = scalar_lea.sflag [#allocation4], %s512_s0 }
 0x2d8   : > { %s1122_s15 = scalar_lea.hbm %s1904_s24, %s1295_s28 }
 0x2d9   : > { %s1126_s3 = sshll.u32 %s1122_s15, 4  ;;  %s1127_s3 = int_to_ptr.hbm [resolvable:$true] %s1126_s3 }
 0x2da   : > { %s1470_s4 = sshra.s32 %s1127_s3, 4  ;;  %s1471_s4 = int_to_ptr.hbm [resolvable:$true] %s1470_s4 }
 0x2db   : > { %p1477_p5 = scmp.lt.s32.totalorder %s1471_s4, %s1904_s24 }
 0x31a   : > { %v750_v37 = vpop.xlane.xlu1 %749 }
 0x31b   : > { %v751_v38 = vsub.f32 %v744_v21, %v750_v37 }
 0x31d   : > { %v752_v39 = vmul.f32 1.442695, %v751_v38  ;;  %v1305_v38 = vld [vmem:[%s1878_s11 + $0x8] sm:$0xff] }
 0x31f   : > { %1408 = vpow2.f32 %v752_v39  ;;  %v1313_v39 = vld [vmem:[%s1880_s13 + $0x38] sm:$0xff] }
 0x320   : > { %1095 = vmatpush.bf16.msra.mxu3 %v1313_v39 }
 0x325   : > { %v1409_v40 = vpop.eup %1408 }
 0x326   : > { %v757_v41 = vpack.c.bf16 %v1409_v40, %v1409_v40  ;;  %v754_v42 = vsel %vm665_vm8, %v1409_v40, 0.0 }
 0x327   : > { %755 = vadd.xlane.f32.xlu2 %v754_v42 }
 0x328   : > { %1239 = vmatmul.msk.bf16.vlgmr.msra.gmra.mxu0 %vm665_vm8, %v757_v41 }
 0x32a   : > { %v806_v43 = vpop.xlane.xlu0 %805 }
 0x32b   : > { %v807_v44 = vsub.f32 %v800_v24, %v806_v43 }
 0x32d   : > { %v808_v45 = vmul.f32 1.442695, %v807_v44 }
 0x32f   : > { %1410 = vpow2.f32 %v808_v45  ;;  %692 = vadd.xlane.f32.xlu2 %v691_v46 }
 0x331   : > { %v862_v47 = vpop.xlane.xlu1 %861 }
 0x332   : > { %v863_v48 = vsub.f32 %v856_v28, %v862_v47 }
 0x334   : > { %v864_v49 = vmul.f32 1.442695, %v863_v48 }
 0x335   : > { %v1411_v50 = vpop.eup %1410 }
 0x336   : > { %1412 = vpow2.f32 %v864_v49  ;;  %v810_v51 = vsel %vm665_vm8, %v1411_v50, 0.0  ;;  %v813_v56 = vpack.c.bf16 %v1411_v50, %v1411_v50  ;;  %v1396_v49 = vld [vmem:[%s1876_s9] ss:$0 sm:$0xff] }
 0x337   : > { %811 = vadd.xlane.f32.xlu0 %v810_v51 }
 0x33c   : > { %v1413_v52 = vpop.eup %1412 }
 0x33d   : > { %v866_v53 = vsel %vm665_vm8, %v1413_v52, 0.0  ;;  %v815_v54 = vpop.permute.xlu0 %814  ;;  %v869_v60 = vpack.c.bf16 %v1413_v52, %v1413_v52 }
 0x33e   : > { %867 = vadd.xlane.f32.xlu1 %v866_v53  ;;  %v820_v55 = vsel %vm703_vm9, %v815_v54, 0 }
 0x33f   : > { %829 = vmatpush.bf16.msrb.mxu2 %v820_v55  ;;  %v1312_v55 = vld [vmem:[%s1880_s13 + $0x30] sm:$0xff] }
 0x340   : > { %1096 = vmatpush.bf16.msra.mxu3 %v1312_v55 }
 0x342   : > { %1241 = vmatmul.msk.bf16.vlgmr.msrb.gmra.mxu2 %vm665_vm8, %v813_v56  ;;  %v1311_v56 = vld [vmem:[%s1880_s13 + $0x28] sm:$0xff] }
 0x343   : > { %1010 = vmatpush.bf16.msra.mxu2 %v1305_v38 }
 0x344   : > { %1097 = vmatpush.bf16.msra.mxu3 %v1311_v56 }
 0x346   : > { %v716_v57 = vpop.f32.mrf.mxu0 }
 0x349   : > { %v871_v58 = vpop.permute.xlu1 %870 }
 0x34a   : > { %v876_v59 = vsel %vm703_vm9, %v871_v58, 0  ;;  %v1309_v58 = vld [vmem:[%s1880_s13 + $0x18] sm:$0xff] }
 0x34b   : > { %885 = vmatpush.bf16.msrb.mxu0 %v876_v59  ;;  %v1308_v59 = vld [vmem:[%s1880_s13 + $0x10] sm:$0xff] }
 0x34e   : > { %1243 = vmatmul.msk.bf16.vlgmr.msrb.gmra.mxu0 %vm665_vm8, %v869_v60  ;;  %v718_v61 = vpop.f32.mrf.mxu0  ;;  %v1307_v60 = vld [vmem:[%s1880_s13 + $0x8] sm:$0xff] }
 0x34f   : > { %v1306_v61 = vld [vmem:[%s1880_s13] sm:$0xff] }
 0x39a   : > { %v756_v62 = vpop.xlane.xlu2 %755 }
 0x39b   : > { %1414 = vrcp.f32 %v756_v62  ;;  %v1398_v62 = vld [vmem:[%s1879_s12] ss:$0 sm:$0xff] }
 0x3a1   : > { %v1415_v63 = vpop.eup %1414 }
 0x3a2   : > { %v693_v17 = vpop.xlane.xlu2 %692 }
 0x3a5   : > { %v775_v1 = vpop.f32.mrf.mxu0 }
 0x3a6   : > { %v780_v2 = vmul.f32 %v1415_v63, %v775_v1 }
 0x3a8   : > { %894 = vrot.lane.b32.xlu2 %v780_v2, %s1549_s17  ;;  %s1472_s17 = scalar_lea.hbm %s1471_s4, 8 }
 0x3a9   : > { %p1473_p1 = scmp.ne.s32.totalorder %s1471_s4, %s1472_s17  ;;  %p1478_p6 = scmp.lt.s32.totalorder %s1476_s26, %s1472_s17 }
 0x3aa   : > { %v812_v4 = vpop.xlane.xlu0 %811 }
 0x3ab   : > { %1416 = vrcp.f32 %v812_v4  ;;  %p1474_p2 = pnand %p1473_p1, %p1672_p4  ;;  %p1479_p7 = por %p1478_p6, %p1477_p5 }
 0x3ad   : > { %v777_v3 = vpop.f32.mrf.mxu0  ;;  %p1475_p3 = pneg %p1474_p2 }
 0x3af   : > { %p1480_p9 = pnand %p1479_p7, %p1475_p3 }
 0x3b1   : > { %v868_v5 = vpop.xlane.xlu1 %867  ;;  %v1417_v6 = vpop.eup %1416 }
 0x3b2   : > { %1418 = vrcp.f32 %v868_v5 }
 0x3b3   : > { %1420 = vrcp.f32 %v693_v17 }
 0x3b8   : > { %v1419_v10 = vpop.eup %1418 }
 0x3b9   : > { %v1421_v18 = vpop.eup %1420 }
 0x3ba   : > { %v721_v20 = vmul.f32 %v1421_v18, %v716_v57  ;;  %v1310_v57 = vld [vmem:[%s1880_s13 + $0x20] sm:$0xff] }
 0x3bb   : > { %1098 = vmatpush.bf16.msra.mxu3 %v1310_v57 }
 0x3bf   : > { %1099 = vmatpush.bf16.msra.mxu3 %v1309_v58 }
 0x3c3   : > { %1100 = vmatpush.bf16.msra.mxu3 %v1308_v59 }
 0x3c5   : > { %v831_v7 = vpop.f32.mrf.mxu2 }
 0x3c6   : > { %v836_v9 = vmul.f32 %v1417_v6, %v831_v7 }
 0x3c7   : > { %1101 = vmatpush.bf16.msra.mxu3 %v1307_v60 }
 0x3c8   : > { %898 = vrot.lane.b32.xlu0 %v836_v9, %s1550_s25 }
 0x3cb   : > { %v887_v11 = vpop.f32.mrf.mxu0  ;;  %1102 = vmatpush.bf16.msra.mxu3 %v1306_v61 }
 0x3cc   : > { %v892_v12 = vmul.f32 %v1419_v10, %v887_v11 }
 0x3cd   : > { %v833_v13 = vpop.f32.mrf.mxu2 }
 0x3ce   : > { %902 = vrot.lane.b32.xlu1 %v892_v12, %s1551_s27 }
 0x3d3   : > { %v889_v14 = vpop.f32.mrf.mxu0 }
 0x3d4   : > { %v1399_v14 = vld [vmem:[%s1881_s14] ss:$0 sm:$0xff] }
 0x402   : > { %v895_v19 = vpop.permute.xlu2 %894 }
 0x403   : > { %v905_v22 = vsel %vm665_vm8, %v721_v20, %v895_v19 }
 0x43a   : > { %v899_v21 = vpop.permute.xlu0 %898 }
 0x43b   : > { %v907_v23 = vsel %vm906_vm10, %v905_v22, %v899_v21 }
 0x440   : > { %v903_v24 = vpop.permute.xlu1 %902 }
 0x441   : > { %v909_v25 = vsel %vm908_vm11, %v907_v23, %v903_v24 }
 0x442   : > { %v910_v26 = vpack.c.bf16 %v909_v25, %v909_v25 }
 0x444   : > { %1252 = vmatmul.msk.bf16.vlgmr.msra.gmra.mxu1 %vm526_vm0, %v910_v26 }
 0x4c1   : > { %v943_v28 = vpop.f32.mrf.mxu1 }
 0x4c2   : > { %v944_v29 = vadd.f32 %v1395_v27, %v943_v28 }
 0x4c4   : > { %v1777_v30 = vadd.f32 %v944_v29, %v1695_v0  ;;  %v1304_v0 = vld [vmem:[%s1878_s11] sm:$0xff] }
 0x4c5   : > { %1011 = vmatpush.bf16.msra.mxu2 %v1304_v0 }
 0x4c6   : > { %v950_v31 = vsel %vm526_vm0, %v1777_v30, 0.0 }
 0x4c7   : > { %951 = vadd.xlane.f32.xlu0 %v950_v31 }
 0x4c9   : > { %v945_v32 = vpop.f32.mrf.mxu1 }
 0x53a   : > { %v952_v33 = vpop.xlane.xlu0 %951 }
 0x53b   : > { %v953_v34 = vmul.f32 %v952_v33, %v1699_v8 }
 0x53d   : > { %v954_v35 = vsub.f32 %v1777_v30, %v953_v34 }
 0x53f   : > { %v955_v36 = vmul.f32 %v954_v35, %v954_v35 }
 0x541   : > { %v956_v37 = vsel %vm526_vm0, %v955_v36, 0.0 }
 0x542   : > { %957 = vadd.xlane.f32.xlu2 %v956_v37 }
 0x5b5   : > { %v958_v40 = vpop.xlane.xlu2 %957 }
 0x5b6   : > { %v959_v41 = vmul.f32 %v958_v40, %v1699_v8  ;;  %v1397_v8 = vld [vmem:[%s1877_s10] ss:$0 sm:$0xff] }
 0x5b8   : > { %v960_v42 = vadd.f32 1e-05, %v959_v41 }
 0x5ba   : > { %1422 = vrsqrt.f32 %v960_v42  ;;  %vm967_vm13 = vweird.f32 %v960_v42 }
 0x5c0   : > { %v1423_v43 = vpop.eup %1422 }
 0x5c1   : > { %v962_v44 = vmul.f32 %v1423_v43, %v960_v42  ;;  %vm968_vm12 = vweird.f32 %v1423_v43 }
 0x5c2   : > { %vm969_vm14 = vmor %vm967_vm13, %vm968_vm12 }
 0x5c3   : > { %v963_v45 = vmul.f32 %v1423_v43, %v962_v44 }
 0x5c5   : > { %v964_v46 = vmul.f32 0.5, %v963_v45 }
 0x5c7   : > { %v965_v47 = vsub.f32 1.5, %v964_v46 }
 0x5c9   : > { %v966_v48 = vmul.f32 %v1423_v43, %v965_v47 }
 0x5cb   : > { %v970_v50 = vsel %vm969_vm14, %v1423_v43, %v966_v48 }
 0x5cc   : > { %v971_v51 = vmul.f32 %v970_v50, %v954_v35 }
 0x5ce   : > { %v975_v52 = vmul.f32 %v1396_v49, %v971_v51 }
 0x5d0   : > { %v979_v53 = vadd.f32 %v1397_v8, %v975_v52 }
 0x5d2   : > { %v980_v54 = vpack.c.bf16 %v979_v53, %v979_v53 }
 0x5d4   : > { %1261 = vmatmul.msk.bf16.vlgmr.msra.gmra.mxu2 %vm526_vm0, %v980_v54 }
 0x657   : > { %v1013_v63 = vpop.f32.mrf.mxu2 }
 0x658   : > { %v1014_v1 = vadd.f32 %v1398_v62, %v1013_v63 }
 0x65a   : > { %v1017_v2 = vmul.f32 %v1014_v1, %v1014_v1 }
 0x65c   : > { %v1018_v3 = vmul.f32 %v1017_v2, %v1014_v1 }
 0x65e   : > { %v1019_v4 = vmul.f32 0.044715, %v1018_v3 }
 0x65f   : > { %v1015_v5 = vpop.f32.mrf.mxu2 }
 0x660   : > { %v1020_v6 = vadd.f32 %v1019_v4, %v1014_v1 }
 0x662   : > { %v1021_v7 = vmul.f32 0.7978846, %v1020_v6 }
 0x664   : > { %1424 = vtanh.f32 %v1021_v7 }
 0x66a   : > { %v1425_v9 = vpop.eup %1424 }
 0x66b   : > { %v1023_v10 = vadd.f32 1.0, %v1425_v9 }
 0x66d   : > { %v1024_v11 = vmul.f32 0.5, %v1023_v10 }
 0x66f   : > { %v1025_v12 = vmul.f32 %v1024_v11, %v1014_v1 }
 0x671   : > { %v1026_v13 = vpack.c.bf16 %v1025_v12, %v1025_v12 }
 0x673   : > { %1103 = vmatmul.bf16.vlgmr.msra.gmra.mxu3 %v1026_v13 }
 0x6f6   : > { %v1104_v15 = vpop.f32.mrf.mxu3 }
 0x6f7   : > { %v1105_v16 = vadd.f32 %v1399_v14, %v1104_v15 }
 0x6f9   : > { %v1108_v17 = vadd.f32 %v1105_v16, %v1777_v30 }
 0x6fb   : > { %1109 = vst.msk [vmem:[%s514_s1] sm:$0xff] %vm526_vm0, %v1108_v17 }
 0x6fc   : > { %1483 = shalt.err (!%p1480_p9)
}
 0x6fd   : > { %1318 = dma.vmem_to_hbm [thread:$0]  (%p1672_p4), %s1125_s2, 128, %s1127_s3, %s1111_s21  }
 0x6fe   : > { %v1106_v18 = vpop.f32.mrf.mxu3 }
 0x6ff PF: > { %s1906_s1 = sld [smem:[#allocation8_spill]]  ;;  %p1330_p10 = scmp.ge.s32.totalorder %s1538_s23, 2 }
 0x701   : > { %p1325_p11 = pnand %p1330_p10, %p1679_p8 }
 0x703   : > { %p1326_p12 = pneg %p1325_p11 }
 0x705   : > { %s1138_s0 = sand.u32 1, %s1906_s1  }
 0x706   : > { %s1139_s15 = scalar_lea.sflag [#allocation4], %s1138_s0 }
 0x707   : > { %1513 = dma.done.wait (%p1326_p12), %s1139_s15, 128  }
 0x708   : > { %1515 = vsyncadd (%p1326_p12), %s1139_s15, 4294967168  ;;  %s29_s23 = sadd.s32 1, %s1538_s23   ;;  %s1907_s2 = sld [smem:[#allocation9_spill]] }
 0x709   : > { %p26_p13 = scmp.ge.s32.totalorder %s29_s23, 4   ;;  %s1908_s18 = smov %s1522_s19 }
 0x70a   : > { %s1909_s19 = smov %s1526_s20  ;;  %s1910_s20 = smov %s1685_s16 }
 0x70b   : > { %s1911_s21 = smov %s1534_s22  ;;  %28 = sbr.rel (!%p26_p13) target bundleno = 12 (0xc), region = 121 }
 0x70e   : > { %s1912_s22 = smov %s1907_s2 }
 0x710   :  { %1145 = vsyncpa [#allocation3], 1 }
 0x711   :  { %1147 = vsyncpa [#allocation3 + $0x1], 1 }
 0x712   :  { %1148 = vsyncpa [#allocation4], 1 }
 0x713   :  { %1150 = vsyncpa [#allocation4 + $0x1], 1 }

</bundles_post_ra>
